<compile_context>
chip_gen: v5e
topology: v5e:2x2
jax: 0.10.0
libtpu: 0.0.40
codegen_flags: <defaults>
</compile_context>

<pallas_src>
import jax
import jax.numpy as jnp
from jax import lax
from jax.experimental import pallas as pl
from jax.experimental.pallas import tpu as pltpu


def _round_up(x, m):
    return ((x + m - 1) // m) * m


def _pad2(a, rows, cols):
    return jnp.pad(a, ((0, rows - a.shape[0]), (0, cols - a.shape[1])))


def edgeconv_kernel(ind1c_ref, ind1r_ref, ind2c_ref, feat_ref,
                    w1d_ref, w1b_ref, b1_ref, w2_ref, b2_ref,
                    wsc_ref, bsc_ref, out_ref):
    core = pl.program_id(0)   # "parallel" axis (megacore split of the edges)
    tile = pl.program_id(1)   # "arbitrary" reduction axis over edge tiles

    feat = feat_ref[...]                                   # [NP, FP]
    n_p = feat_ref.shape[0]

    # Initialize the resident per-core accumulator on its first edge tile.
    @pl.when(tile == 0)
    def _():
        out_ref[...] = jnp.zeros_like(out_ref)

    # Core 0 seeds its accumulator with the shortcut projection so the outside
    # epilogue is only partial-sum + ReLU + slice.
    @pl.when((tile == 0) & (core == 0))
    def _():
        sc = jnp.dot(feat, wsc_ref[...],
                     preferred_element_type=jnp.float32) + bsc_ref[...]
        out_ref[...] = sc

    lane_iota = lax.broadcasted_iota(jnp.int32, (1, n_p), 1)       # [1, NP]
    node_iota = lax.broadcasted_iota(jnp.int32, (n_p, 1), 0)       # [NP, 1]

    # Gather one-hots (padded edges have index -1 -> all-zero rows).
    oh1 = (ind1c_ref[...] == lane_iota).astype(jnp.float32)        # [tE, NP]
    oh2 = (ind2c_ref[...] == lane_iota).astype(jnp.float32)        # [tE, NP]
    # Scatter one-hot built directly transposed (no in-kernel transpose).
    oh1_t = (node_iota == ind1r_ref[...]).astype(jnp.float32)      # [NP, tE]

    # Gather: features[ind_p1], features[ind_p2] via one-hot matmul (MXU).
    g1 = jnp.dot(oh1, feat, preferred_element_type=jnp.float32)    # [tE, FP]
    g2 = jnp.dot(oh2, feat, preferred_element_type=jnp.float32)    # [tE, FP]

    # Folded first conv layer: concat([p1, p2]) @ W1 + b1
    #   == g1 @ (W1a - W1b) + g2 @ W1b + b1     (p2 = g2 - g1)
    h = (jnp.dot(g1, w1d_ref[...], preferred_element_type=jnp.float32)
         + jnp.dot(g2, w1b_ref[...], preferred_element_type=jnp.float32)
         + b1_ref[...])
    h = jnp.maximum(h, 0.0)
    # dropout after layer 0: identity (eval mode)
    h = jnp.dot(h, w2_ref[...], preferred_element_type=jnp.float32) + b2_ref[...]
    h = jnp.maximum(h, 0.0)                                        # [tE, H2P]

    # scatter_add over ind_p1, accumulated in the resident output block.
    out_ref[...] += jnp.dot(oh1_t, h, preferred_element_type=jnp.float32)


def edge_conv_block(features, ind_p1, ind_p2, params, *, tile_e=256, n_cores=2):
    """features: [N, F] f32, ind_p1/ind_p2: [E] int32.

    Returns [N, out_feats[-1]] f32 (EdgeConvBlock.forward, eval mode,
    weighted_aggr=False).
    """
    w1, b1, w2, b2, wsc, bsc = params
    n, f = features.shape
    h1 = w1.shape[1]
    h2 = w2.shape[1]
    e = ind_p1.shape[0]

    # Lane-dense padding of every channel / node dimension.
    fp = _round_up(f, 128)
    h1p = _round_up(h1, 128)
    h2p = _round_up(h2, 128)
    np_ = _round_up(n, 128)

    feat_p = _pad2(features.astype(jnp.float32), np_, fp)

    # Fold the first layer: W1 = [W1a; W1b] acting on [p1, p2 = g2 - g1].
    w1a, w1b = w1[:f], w1[f:]
    w1d_p = _pad2(w1a - w1b, fp, h1p)
    w1b_p = _pad2(w1b, fp, h1p)
    b1_p = _pad2(b1.reshape(1, h1), 1, h1p)
    w2_p = _pad2(w2, h1p, h2p)
    b2_p = _pad2(b2.reshape(1, h2), 1, h2p)
    wsc_p = _pad2(wsc, fp, h2p)
    bsc_p = _pad2(bsc.reshape(1, h2), 1, h2p)

    # Pad edges to a multiple of n_cores * tile_e with index -1 (matches no
    # node -> zero contribution to both gather and scatter).
    e_pad = _round_up(max(e, 1), n_cores * tile_e)
    pad = e_pad - e
    ind1 = jnp.pad(ind_p1.astype(jnp.int32), (0, pad), constant_values=-1)
    ind2 = jnp.pad(ind_p2.astype(jnp.int32), (0, pad), constant_values=-1)
    ind1_col = ind1.reshape(e_pad, 1)
    ind1_row = ind1.reshape(1, e_pad)
    ind2_col = ind2.reshape(e_pad, 1)

    tpc = e_pad // (n_cores * tile_e)          # edge tiles per core
    grid = (n_cores, tpc)

    def full(shape):
        return pl.BlockSpec(shape, lambda c, i: (0, 0))

    partials = pl.pallas_call(
        edgeconv_kernel,
        out_shape=jax.ShapeDtypeStruct((n_cores, np_, h2p), jnp.float32),
        grid_spec=pltpu.PrefetchScalarGridSpec(
            num_scalar_prefetch=0,
            grid=grid,
            in_specs=[
                pl.BlockSpec((tile_e, 1), lambda c, i: (c * tpc + i, 0)),  # ind_p1 [E,1]
                pl.BlockSpec((1, tile_e), lambda c, i: (0, c * tpc + i)),  # ind_p1 [1,E]
                pl.BlockSpec((tile_e, 1), lambda c, i: (c * tpc + i, 0)),  # ind_p2 [E,1]
                full((np_, fp)),     # features (padded, fully resident)
                full((fp, h1p)),     # W1a - W1b
                full((fp, h1p)),     # W1b
                full((1, h1p)),      # b1
                full((h1p, h2p)),    # W2
                full((1, h2p)),      # b2
                full((fp, h2p)),     # W_sc
                full((1, h2p)),      # b_sc
            ],
            out_specs=pl.BlockSpec((None, np_, h2p), lambda c, i: (c, 0, 0)),
        ),
        compiler_params=pltpu.CompilerParams(
            dimension_semantics=("parallel", "arbitrary")),
    )(ind1_col, ind1_row, ind2_col, feat_p,
      w1d_p, w1b_p, b1_p, w2_p, b2_p, wsc_p, bsc_p)

    # Tiny epilogue: combine per-core partials (shortcut already folded into
    # the core-0 partial), final ReLU, strip the padding.
    out = jnp.maximum(jnp.sum(partials, axis=0), 0.0)
    return out[:n, :h2]


def reference(features, ind_p1, ind_p2, params):
    """Pure-JAX replica of EdgeConvBlock.forward (eval mode, weighted_aggr=False)."""
    w1, b1, w2, b2, wsc, bsc = params
    p1 = features[ind_p1]
    p2 = features[ind_p2] - p1
    x = jnp.concatenate([p1, p2], axis=1)
    x = jnp.maximum(x @ w1 + b1, 0.0)
    x = jnp.maximum(x @ w2 + b2, 0.0)
    n = features.shape[0]
    summed = jnp.zeros((n, w2.shape[1]), jnp.float32).at[ind_p1].add(x)
    sc = features @ wsc + bsc
    return jnp.maximum(sc + summed, 0.0)


if __name__ == "__main__":
    key = jax.random.PRNGKey(0)

    # Small shapes consistent with the module's forward:
    N = 64                  # number of nodes
    F = 16                  # in_feat
    OUT_FEATS = (32, 48)    # two conv layers; in_feat != out_feats[-1] -> shortcut Linear
    E = 100                 # number of edges

    ks = jax.random.split(key, 10)
    features = jax.random.normal(ks[0], (N, F), dtype=jnp.float32)
    ind_p1 = jax.random.randint(ks[1], (E,), 0, N, dtype=jnp.int32)
    ind_p2 = jax.random.randint(ks[2], (E,), 0, N, dtype=jnp.int32)

    # Deterministic parameter init (synthetic weights, [in, out] layout).
    w1 = 0.1 * jax.random.normal(ks[3], (2 * F, OUT_FEATS[0]), dtype=jnp.float32)
    b1 = 0.1 * jax.random.normal(ks[4], (1, OUT_FEATS[0]), dtype=jnp.float32)
    w2 = 0.1 * jax.random.normal(ks[5], (OUT_FEATS[0], OUT_FEATS[1]), dtype=jnp.float32)
    b2 = 0.1 * jax.random.normal(ks[6], (1, OUT_FEATS[1]), dtype=jnp.float32)
    wsc = 0.1 * jax.random.normal(ks[7], (F, OUT_FEATS[1]), dtype=jnp.float32)
    bsc = 0.1 * jax.random.normal(ks[8], (1, OUT_FEATS[1]), dtype=jnp.float32)
    params = (w1, b1, w2, b2, wsc, bsc)

    out = edge_conv_block(features, ind_p1, ind_p2, params, tile_e=256, n_cores=2)
    out = jax.block_until_ready(out)

    ref = jax.block_until_ready(reference(features, ind_p1, ind_p2, params))
    assert out.shape == (N, OUT_FEATS[-1])
    assert jnp.allclose(out, ref, rtol=1e-5, atol=1e-4), "kernel/reference mismatch"

    print("KERNEL_OK")
</pallas_src>

<mosaic_0001>
module attributes {stable_mosaic.version = 11 : i64} {
  func.func @edgeconv_kernel(%arg0: i32, %arg1: i32, %arg2: memref<256x1xi32, #tpu.memory_space<vmem>>, %arg3: memref<1x256xi32, #tpu.memory_space<vmem>>, %arg4: memref<256x1xi32, #tpu.memory_space<vmem>>, %arg5: memref<128x128xf32, #tpu.memory_space<vmem>>, %arg6: memref<128x128xf32, #tpu.memory_space<vmem>>, %arg7: memref<128x128xf32, #tpu.memory_space<vmem>>, %arg8: memref<1x128xf32, #tpu.memory_space<vmem>>, %arg9: memref<128x128xf32, #tpu.memory_space<vmem>>, %arg10: memref<1x128xf32, #tpu.memory_space<vmem>>, %arg11: memref<128x128xf32, #tpu.memory_space<vmem>>, %arg12: memref<1x128xf32, #tpu.memory_space<vmem>>, %arg13: memref<1x128x128xf32, #tpu.memory_space<vmem>>) attributes {dimension_semantics = [#tpu.dimension_semantics<parallel>, #tpu.dimension_semantics<arbitrary>], iteration_bounds = array<i64: 2, 1>, scalar_prefetch = 0 : i64, scratch_operands = 0 : i64, tpu.core_type = #tpu.core_type<tc>, window_params = [{transform_indices = @transform_0, window_bounds = array<i64: 256, 1>}, {transform_indices = @transform_1, window_bounds = array<i64: 1, 256>}, {transform_indices = @transform_2, window_bounds = array<i64: 256, 1>}, {pipeline_mode = #tpu.pipeline_mode<synchronous>, transform_indices = @transform_3, window_bounds = array<i64: 128, 128>}, {pipeline_mode = #tpu.pipeline_mode<synchronous>, transform_indices = @transform_4, window_bounds = array<i64: 128, 128>}, {pipeline_mode = #tpu.pipeline_mode<synchronous>, transform_indices = @transform_5, window_bounds = array<i64: 128, 128>}, {pipeline_mode = #tpu.pipeline_mode<synchronous>, transform_indices = @transform_6, window_bounds = array<i64: 1, 128>}, {pipeline_mode = #tpu.pipeline_mode<synchronous>, transform_indices = @transform_7, window_bounds = array<i64: 128, 128>}, {pipeline_mode = #tpu.pipeline_mode<synchronous>, transform_indices = @transform_8, window_bounds = array<i64: 1, 128>}, {pipeline_mode = #tpu.pipeline_mode<synchronous>, transform_indices = @transform_9, window_bounds = array<i64: 128, 128>}, {pipeline_mode = #tpu.pipeline_mode<synchronous>, transform_indices = @transform_10, window_bounds = array<i64: 1, 128>}, {transform_indices = @transform_11, window_bounds = array<i64: 1, 128, 128>}]} {
    %c0 = arith.constant 0 : index
    %c0_0 = arith.constant 0 : index
    %0 = vector.load %arg5[%c0, %c0_0] : memref<128x128xf32, #tpu.memory_space<vmem>>, vector<128x128xf32>
    %c0_i32 = arith.constant 0 : i32
    %1 = arith.cmpi eq, %arg1, %c0_i32 : i32
    %2 = arith.extui %1 : i1 to i32
    %c0_i32_1 = arith.constant 0 : i32
    %3 = arith.cmpi ne, %2, %c0_i32_1 : i32
    scf.if %3 {
      %cst_34 = arith.constant 0.000000e+00 : f32
      %55 = vector.broadcast %cst_34 : f32 to vector<128x128xf32>
      %c0_35 = arith.constant 0 : index
      %c0_36 = arith.constant 0 : index
      %c0_37 = arith.constant 0 : index
      %56 = vector.load %arg13[%c0_35, %c0_36, %c0_37] : memref<1x128x128xf32, #tpu.memory_space<vmem>>, vector<1x128x128xf32>
      %57 = vector.shape_cast %56 : vector<1x128x128xf32> to vector<128x128xf32>
      %58 = vector.shape_cast %55 : vector<128x128xf32> to vector<1x128x128xf32>
      tpu.vector_store %arg13[%c0_35, %c0_36, %c0_37], %58 {strides = array<i32>} : memref<1x128x128xf32, #tpu.memory_space<vmem>>, vector<1x128x128xf32>,
    } else {
    }
    %c0_i32_2 = arith.constant 0 : i32
    %4 = arith.cmpi eq, %arg1, %c0_i32_2 : i32
    %c0_i32_3 = arith.constant 0 : i32
    %5 = arith.cmpi eq, %arg0, %c0_i32_3 : i32
    %6 = arith.andi %4, %5 : i1
    %7 = arith.extui %6 : i1 to i32
    %c0_i32_4 = arith.constant 0 : i32
    %8 = arith.cmpi ne, %7, %c0_i32_4 : i32
    scf.if %8 {
      %c0_34 = arith.constant 0 : index
      %c0_35 = arith.constant 0 : index
      %55 = vector.load %arg11[%c0_34, %c0_35] : memref<128x128xf32, #tpu.memory_space<vmem>>, vector<128x128xf32>
      %cst_36 = arith.constant dense<0.000000e+00> : vector<128x128xf32>
      %56 = tpu.matmul %0, %55, %cst_36 {dimension_numbers = #tpu.dot_dimension_numbers<[1], [0], [0], [1], [0, 0, 1, 1], [], []>} : vector<128x128xf32>, vector<128x128xf32>, vector<128x128xf32> -> vector<128x128xf32>
      %c0_37 = arith.constant 0 : index
      %c0_38 = arith.constant 0 : index
      %57 = vector.load %arg12[%c0_37, %c0_38] : memref<1x128xf32, #tpu.memory_space<vmem>>, vector<1x128xf32>
      %58 = vector.broadcast %57 : vector<1x128xf32> to vector<128x128xf32>
      %59 = arith.addf %56, %58 : vector<128x128xf32>
      %c0_39 = arith.constant 0 : index
      %c0_40 = arith.constant 0 : index
      %c0_41 = arith.constant 0 : index
      %60 = vector.load %arg13[%c0_39, %c0_40, %c0_41] : memref<1x128x128xf32, #tpu.memory_space<vmem>>, vector<1x128x128xf32>
      %61 = vector.shape_cast %60 : vector<1x128x128xf32> to vector<128x128xf32>
      %62 = vector.shape_cast %59 : vector<128x128xf32> to vector<1x128x128xf32>
      tpu.vector_store %arg13[%c0_39, %c0_40, %c0_41], %62 {strides = array<i32>} : memref<1x128x128xf32, #tpu.memory_space<vmem>>, vector<1x128x128xf32>,
    } else {
    }
    %9 = tpu.iota {dimensions = array<i32: 1>} : vector<1x128xi32>
    %10 = tpu.iota {dimensions = array<i32: 0>} : vector<128x1xi32>
    %c0_5 = arith.constant 0 : index
    %c0_6 = arith.constant 0 : index
    %11 = vector.load %arg2[%c0_5, %c0_6] : memref<256x1xi32, #tpu.memory_space<vmem>>, vector<256x1xi32>
    %12 = vector.broadcast %11 : vector<256x1xi32> to vector<256x128xi32>
    %13 = vector.broadcast %9 : vector<1x128xi32> to vector<256x128xi32>
    %14 = arith.cmpi eq, %12, %13 : vector<256x128xi32>
    %15 = arith.extui %14 : vector<256x128xi1> to vector<256x128xi32>
    %16 = arith.sitofp %15 : vector<256x128xi32> to vector<256x128xf32>
    %c0_7 = arith.constant 0 : index
    %c0_8 = arith.constant 0 : index
    %17 = vector.load %arg4[%c0_7, %c0_8] : memref<256x1xi32, #tpu.memory_space<vmem>>, vector<256x1xi32>
    %18 = vector.broadcast %17 : vector<256x1xi32> to vector<256x128xi32>
    %19 = vector.broadcast %9 : vector<1x128xi32> to vector<256x128xi32>
    %20 = arith.cmpi eq, %18, %19 : vector<256x128xi32>
    %21 = arith.extui %20 : vector<256x128xi1> to vector<256x128xi32>
    %22 = arith.sitofp %21 : vector<256x128xi32> to vector<256x128xf32>
    %c0_9 = arith.constant 0 : index
    %c0_10 = arith.constant 0 : index
    %23 = vector.load %arg3[%c0_9, %c0_10] : memref<1x256xi32, #tpu.memory_space<vmem>>, vector<1x256xi32>
    %24 = vector.broadcast %10 : vector<128x1xi32> to vector<128x256xi32>
    %25 = vector.broadcast %23 : vector<1x256xi32> to vector<128x256xi32>
    %26 = arith.cmpi eq, %24, %25 : vector<128x256xi32>
    %27 = arith.extui %26 : vector<128x256xi1> to vector<128x256xi32>
    %28 = arith.sitofp %27 : vector<128x256xi32> to vector<128x256xf32>
    %cst = arith.constant dense<0.000000e+00> : vector<256x128xf32>
    %29 = tpu.matmul %16, %0, %cst {dimension_numbers = #tpu.dot_dimension_numbers<[1], [0], [0], [1], [0, 0, 1, 1], [], []>} : vector<256x128xf32>, vector<128x128xf32>, vector<256x128xf32> -> vector<256x128xf32>
    %cst_11 = arith.constant dense<0.000000e+00> : vector<256x128xf32>
    %30 = tpu.matmul %22, %0, %cst_11 {dimension_numbers = #tpu.dot_dimension_numbers<[1], [0], [0], [1], [0, 0, 1, 1], [], []>} : vector<256x128xf32>, vector<128x128xf32>, vector<256x128xf32> -> vector<256x128xf32>
    %c0_12 = arith.constant 0 : index
    %c0_13 = arith.constant 0 : index
    %31 = vector.load %arg6[%c0_12, %c0_13] : memref<128x128xf32, #tpu.memory_space<vmem>>, vector<128x128xf32>
    %cst_14 = arith.constant dense<0.000000e+00> : vector<256x128xf32>
    %32 = tpu.matmul %29, %31, %cst_14 {dimension_numbers = #tpu.dot_dimension_numbers<[1], [0], [0], [1], [0, 0, 1, 1], [], []>} : vector<256x128xf32>, vector<128x128xf32>, vector<256x128xf32> -> vector<256x128xf32>
    %c0_15 = arith.constant 0 : index
    %c0_16 = arith.constant 0 : index
    %33 = vector.load %arg7[%c0_15, %c0_16] : memref<128x128xf32, #tpu.memory_space<vmem>>, vector<128x128xf32>
    %cst_17 = arith.constant dense<0.000000e+00> : vector<256x128xf32>
    %34 = tpu.matmul %30, %33, %cst_17 {dimension_numbers = #tpu.dot_dimension_numbers<[1], [0], [0], [1], [0, 0, 1, 1], [], []>} : vector<256x128xf32>, vector<128x128xf32>, vector<256x128xf32> -> vector<256x128xf32>
    %35 = arith.addf %32, %34 : vector<256x128xf32>
    %c0_18 = arith.constant 0 : index
    %c0_19 = arith.constant 0 : index
    %36 = vector.load %arg8[%c0_18, %c0_19] : memref<1x128xf32, #tpu.memory_space<vmem>>, vector<1x128xf32>
    %37 = vector.broadcast %36 : vector<1x128xf32> to vector<256x128xf32>
    %38 = arith.addf %35, %37 : vector<256x128xf32>
    %cst_20 = arith.constant 0.000000e+00 : f32
    %39 = vector.broadcast %cst_20 : f32 to vector<256x128xf32>
    %40 = arith.maximumf %38, %39 : vector<256x128xf32>
    %c0_21 = arith.constant 0 : index
    %c0_22 = arith.constant 0 : index
    %41 = vector.load %arg9[%c0_21, %c0_22] : memref<128x128xf32, #tpu.memory_space<vmem>>, vector<128x128xf32>
    %cst_23 = arith.constant dense<0.000000e+00> : vector<256x128xf32>
    %42 = tpu.matmul %40, %41, %cst_23 {dimension_numbers = #tpu.dot_dimension_numbers<[1], [0], [0], [1], [0, 0, 1, 1], [], []>} : vector<256x128xf32>, vector<128x128xf32>, vector<256x128xf32> -> vector<256x128xf32>
    %c0_24 = arith.constant 0 : index
    %c0_25 = arith.constant 0 : index
    %43 = vector.load %arg10[%c0_24, %c0_25] : memref<1x128xf32, #tpu.memory_space<vmem>>, vector<1x128xf32>
    %44 = vector.broadcast %43 : vector<1x128xf32> to vector<256x128xf32>
    %45 = arith.addf %42, %44 : vector<256x128xf32>
    %cst_26 = arith.constant 0.000000e+00 : f32
    %46 = vector.broadcast %cst_26 : f32 to vector<256x128xf32>
    %47 = arith.maximumf %45, %46 : vector<256x128xf32>
    %c0_27 = arith.constant 0 : index
    %c0_28 = arith.constant 0 : index
    %c0_29 = arith.constant 0 : index
    %48 = vector.load %arg13[%c0_27, %c0_28, %c0_29] : memref<1x128x128xf32, #tpu.memory_space<vmem>>, vector<1x128x128xf32>
    %49 = vector.shape_cast %48 : vector<1x128x128xf32> to vector<128x128xf32>
    %cst_30 = arith.constant dense<0.000000e+00> : vector<128x128xf32>
    %50 = tpu.matmul %28, %47, %cst_30 {dimension_numbers = #tpu.dot_dimension_numbers<[1], [0], [0], [1], [0, 0, 1, 1], [], []>} : vector<128x256xf32>, vector<256x128xf32>, vector<128x128xf32> -> vector<128x128xf32>
    %51 = arith.addf %49, %50 : vector<128x128xf32>
    %c0_31 = arith.constant 0 : index
    %c0_32 = arith.constant 0 : index
    %c0_33 = arith.constant 0 : index
    %52 = vector.load %arg13[%c0_31, %c0_32, %c0_33] : memref<1x128x128xf32, #tpu.memory_space<vmem>>, vector<1x128x128xf32>
    %53 = vector.shape_cast %52 : vector<1x128x128xf32> to vector<128x128xf32>
    %54 = vector.shape_cast %51 : vector<128x128xf32> to vector<1x128x128xf32>
    tpu.vector_store %arg13[%c0_31, %c0_32, %c0_33], %54 {strides = array<i32>} : memref<1x128x128xf32, #tpu.memory_space<vmem>>, vector<1x128x128xf32>,
    return
  }
  func.func @transform_0(%arg0: i32, %arg1: i32) -> (i32, i32) {
    %c1_i32 = arith.constant 1 : i32
    %0 = arith.muli %arg0, %c1_i32 : i32
    %1 = arith.addi %0, %arg1 : i32
    %c0_i32 = arith.constant 0 : i32
    %c0_i32_0 = arith.constant 0 : i32
    return %1, %c0_i32 : i32, i32
  }
  func.func @transform_1(%arg0: i32, %arg1: i32) -> (i32, i32) {
    %c1_i32 = arith.constant 1 : i32
    %0 = arith.muli %arg0, %c1_i32 : i32
    %1 = arith.addi %0, %arg1 : i32
    %c0_i32 = arith.constant 0 : i32
    %c0_i32_0 = arith.constant 0 : i32
    return %c0_i32, %1 : i32, i32
  }
  func.func @transform_2(%arg0: i32, %arg1: i32) -> (i32, i32) {
    %c1_i32 = arith.constant 1 : i32
    %0 = arith.muli %arg0, %c1_i32 : i32
    %1 = arith.addi %0, %arg1 : i32
    %c0_i32 = arith.constant 0 : i32
    %c0_i32_0 = arith.constant 0 : i32
    return %1, %c0_i32 : i32, i32
  }
  func.func @transform_3(%arg0: i32, %arg1: i32) -> (i32, i32) {
    %c0_i32 = arith.constant 0 : i32
    %c0_i32_0 = arith.constant 0 : i32
    %c0_i32_1 = arith.constant 0 : i32
    return %c0_i32, %c0_i32_0 : i32, i32
  }
  func.func @transform_4(%arg0: i32, %arg1: i32) -> (i32, i32) {
    %c0_i32 = arith.constant 0 : i32
    %c0_i32_0 = arith.constant 0 : i32
    %c0_i32_1 = arith.constant 0 : i32
    return %c0_i32, %c0_i32_0 : i32, i32
  }
  func.func @transform_5(%arg0: i32, %arg1: i32) -> (i32, i32) {
    %c0_i32 = arith.constant 0 : i32
    %c0_i32_0 = arith.constant 0 : i32
    %c0_i32_1 = arith.constant 0 : i32
    return %c0_i32, %c0_i32_0 : i32, i32
  }
  func.func @transform_6(%arg0: i32, %arg1: i32) -> (i32, i32) {
    %c0_i32 = arith.constant 0 : i32
    %c0_i32_0 = arith.constant 0 : i32
    %c0_i32_1 = arith.constant 0 : i32
    return %c0_i32, %c0_i32_0 : i32, i32
  }
  func.func @transform_7(%arg0: i32, %arg1: i32) -> (i32, i32) {
    %c0_i32 = arith.constant 0 : i32
    %c0_i32_0 = arith.constant 0 : i32
    %c0_i32_1 = arith.constant 0 : i32
    return %c0_i32, %c0_i32_0 : i32, i32
  }
  func.func @transform_8(%arg0: i32, %arg1: i32) -> (i32, i32) {
    %c0_i32 = arith.constant 0 : i32
    %c0_i32_0 = arith.constant 0 : i32
    %c0_i32_1 = arith.constant 0 : i32
    return %c0_i32, %c0_i32_0 : i32, i32
  }
  func.func @transform_9(%arg0: i32, %arg1: i32) -> (i32, i32) {
    %c0_i32 = arith.constant 0 : i32
    %c0_i32_0 = arith.constant 0 : i32
    %c0_i32_1 = arith.constant 0 : i32
    return %c0_i32, %c0_i32_0 : i32, i32
  }
  func.func @transform_10(%arg0: i32, %arg1: i32) -> (i32, i32) {
    %c0_i32 = arith.constant 0 : i32
    %c0_i32_0 = arith.constant 0 : i32
    %c0_i32_1 = arith.constant 0 : i32
    return %c0_i32, %c0_i32_0 : i32, i32
  }
  func.func @transform_11(%arg0: i32, %arg1: i32) -> (i32, i32, i32) {
    %c0_i32 = arith.constant 0 : i32
    %c0_i32_0 = arith.constant 0 : i32
    %c0_i32_1 = arith.constant 0 : i32
    return %arg0, %c0_i32, %c0_i32_0 : i32, i32, i32
  }
}

</mosaic_0001>

<bundles_post_ra>
// kernel: tpu_custom_call.1
= control target key start
LH: loop header
LB: loop body
LE: loop exit
PB: predicated region body
PF: predicated region fallthrough
CT: control target
= control target key end

     0   :  { %16 = vsyncpa [#allocation3], 0  ;;  %s3626_s0 = inlined_call_operand.vmem [shape: s32[512,1], index: 0, kind: input, shape index: {}]   ;;  %s3627_s1 = inlined_call_operand.vmem [shape: s32[1,512], index: 1, kind: input, shape index: {}]   ;;  %s3628_s2 = inlined_call_operand.vmem [shape: s32[512,1], index: 2, kind: input, shape index: {}]   ;;  %s3629_s3 = inlined_call_operand.vmem [shape: f32[128,128], index: 3, kind: input, shape index: {}]   ;;  %s3630_s4 = inlined_call_operand.vmem [shape: f32[128,128], index: 4, kind: input, shape index: {}]   ;;  %s3631_s5 = inlined_call_operand.vmem [shape: f32[128,128], index: 5, kind: input, shape index: {}]   ;;  %s3632_s6 = inlined_call_operand.vmem [shape: f32[1,128], index: 6, kind: input, shape index: {}]   ;;  %s3633_s7 = inlined_call_operand.vmem [shape: f32[128,128], index: 7, kind: input, shape index: {}]   ;;  %s3634_s8 = inlined_call_operand.vmem [shape: f32[1,128], index: 8, kind: input, shape index: {}]   ;;  %s3635_s9 = inlined_call_operand.vmem [shape: f32[128,128], index: 9, kind: input, shape index: {}]   ;;  %s3636_s10 = inlined_call_operand.vmem [shape: f32[1,128], index: 10, kind: input, shape index: {}]   ;;  %s3637_s11 = inlined_call_operand.hbm [shape: f32[2,128,128], index: 11, kind: output, shape index: {}]  }
   0x1   :  { %18 = vsyncpa [#allocation3 + $0x1], 0  ;;  %s2657_s17 = smov 0   ;;  %s2659_s18 = smov 0  }
   0x2   :  { %s2661_s19 = smov 0   ;;  %s2663_s20 = smov 0  }
   0x3   :  { %s2665_s21 = smov 0   ;;  %s2667_s22 = smov 0  }
   0x4 LB: > { %3641 = sst [smem:[#allocation5_spill]] %s2586_s21  ;;  %s2171_s23 = sadd.s32 4294967295, %s2590_s22   ;;  %s2590_s22 = sphi %s2667_s22, %s24_s22   ;;  %s2586_s21 = sphi %s2665_s21, %s3650_s21   ;;  %s2582_s20 = sphi %s2663_s20, %s3654_s20   ;;  %s2578_s19 = sphi %s2661_s19, %s3653_s19   ;;  %s2574_s18 = sphi %s2659_s18, %s3652_s18   ;;  %s2570_s17 = sphi %s2657_s17, %s3651_s17  }
   0x5   : > { %s2172_s24 = sadd.s32 4294967294, %s2590_s22   ;;  %s36_s25 = sadd.s32 1, %s2586_s21 }
   0x6   : > { %s295_s26 = sadd.s32 1, %s2578_s19  ;;  %p38_p0 = scmp.ge.s32.totalorder %s36_s25, 2 }
   0x7   : > { %p305_p1 = scmp.ne.s32.totalorder %s2578_s19, %s2574_s18  ;;  %p306_p2 = scmp.eq.s32.totalorder %s2171_s23, 1 }
   0x8   : > { %p311_p3 = scmp.ne.s32.totalorder %s2574_s18, %s2570_s17  ;;  %s3656_s25 = smov (%p38_p0, %s36_s25), 0 }
   0x9   : > { %3642 = sst [smem:[#allocation6_spill]] %s3656_s25  ;;  %p2697_p4 = por %p306_p2, %p305_p1 }
   0xa   : > { %p312_p5 = scmp.eq.s32.totalorder %s2172_s24, 1  ;;  %s292_s28 = ssub.s32 %s2586_s21, %s3656_s25 }
   0xb   : > { %p2175_p6 = scmp.ge.s32.totalorder %s2590_s22, 1  ;;  %p293_p7 = scmp.eq.s32.totalorder %s292_s28, 0 }
   0xc   : > { %p2704_p8 = por %p312_p5, %p311_p3  ;;  %p386_p9 = scmp.lt.s32.totalorder %s2590_s22, 3 }
   0xd   : > { %s2710_s30 = scalar_select %p293_p7, %s2578_s19, %s295_s26  }
   0xe   : > { %p387_p10 = pnand %p2175_p6, %p386_p9 }
   0xf   : > { %3645 = sst [smem:[#allocation7_spill]] %s2710_s30  ;;  %s3640_s12 = sand.u32 (!%p387_p10), 1, %s2574_s18  }
  0x10   : > { %390 = sbr.rel (%p387_p10) target bundleno = 1279 (0x4ff), region = 64  ;;  %s2177_s13 = sshll.u32 (!%p387_p10), %s2582_s20, 5 }
  0x11   : > { %s2176_s28 = sshll.u32 (!%p387_p10), %s3640_s12, 7  ;;  %p440_p11 = scmp.lt.s32.totalorder (!%p387_p10), %s2177_s13, 63 }
  0x12   : > { %s2179_s24 = sshll.u32 (!%p387_p10), %s2582_s20, 1  ;;  %s2777_s25 = scalar_lea.vmem (!%p387_p10), [#allocation2], %s2176_s28 }
  0x13   : > { %p448_p12 = scmp.lt.s32.totalorder (!%p387_p10), %s2179_s24, 3  ;;  %p497_p13 = scmp.eq.s32.totalorder (!%p387_p10), %s2582_s20, 0 }
  0x15   : > { %v2717_v0 = vld [vmem:[%s3629_s3] sm:$0xff]  ;;  %v2722_v1 = vld [vmem:[%s3629_s3 + $0x8] sm:$0xff]  ;;  %v2727_v2 = vld [vmem:[%s3629_s3 + $0x10] sm:$0xff]  ;;  %s3658_s13 = smov (!%p440_p11, %s2177_s13), 63  ;;  %v2592_v12 = vmov 0.0   ;;  %s3660_s24 = smov (!%p448_p12, %s2179_s24), 3 }
  0x16   : > { %v2734_v3 = vld [vmem:[%s3629_s3 + $0x18] sm:$0xff]  ;;  %v2739_v4 = vld [vmem:[%s3629_s3 + $0x20] sm:$0xff]  ;;  %v2744_v5 = vld [vmem:[%s3629_s3 + $0x28] sm:$0xff]  ;;  %481 = vst [vmem:[%s2777_s25] sm:$0xff] %v2592_v12  ;;  %s2178_s30 = sshll.u32 %s3658_s13, 3 }
  0x17   : > { %v2750_v6 = vld [vmem:[%s3629_s3 + $0x30] sm:$0xff]  ;;  %v2755_v7 = vld [vmem:[%s3629_s3 + $0x38] sm:$0xff]  ;;  %v2760_v8 = vld [vmem:[%s3629_s3 + $0x40] sm:$0xff]  ;;  %482 = vst [vmem:[%s2777_s25 + $0x8] sm:$0xff] %v2592_v12  ;;  %s2806_s12 = scalar_lea.vmem %s3626_s0, %s2178_s30  ;;  %s2811_s23 = scalar_lea.vmem %s3628_s2, %s2178_s30 }
  0x18   : > { %v2765_v9 = vld [vmem:[%s3629_s3 + $0x48] sm:$0xff]  ;;  %v2770_v10 = vld [vmem:[%s3629_s3 + $0x50] sm:$0xff]  ;;  %v2775_v11 = vld [vmem:[%s3629_s3 + $0x58] sm:$0xff]  ;;  %483 = vst [vmem:[%s2777_s25 + $0x10] sm:$0xff] %v2592_v12 }
  0x19   : > { %v2783_v13 = vld [vmem:[%s3629_s3 + $0x60] sm:$0xff]  ;;  %v2788_v14 = vld [vmem:[%s3629_s3 + $0x68] sm:$0xff]  ;;  %v2793_v15 = vld [vmem:[%s3629_s3 + $0x70] sm:$0xff]  ;;  %484 = vst [vmem:[%s2777_s25 + $0x18] sm:$0xff] %v2592_v12 }
  0x1a   : > { %v2800_v16 = vld [vmem:[%s3629_s3 + $0x78] sm:$0xff]  ;;  %485 = vst [vmem:[%s2777_s25 + $0x20] sm:$0xff] %v2592_v12  ;;  %v516_v18 = vld [vmem:[%s3635_s9 + $0x70] sm:$0xff] (%p497_p13)  ;;  %v515_v19 = vld [vmem:[%s3635_s9 + $0x68] sm:$0xff] (%p497_p13) }
  0x1b   : > { %486 = vst [vmem:[%s2777_s25 + $0x28] sm:$0xff] %v2592_v12  ;;  %v517_v17 = vld [vmem:[%s3635_s9 + $0x78] sm:$0xff] (%p497_p13)  ;;  %v514_v20 = vld [vmem:[%s3635_s9 + $0x60] sm:$0xff] (%p497_p13)  ;;  %v512_v22 = vld [vmem:[%s3635_s9 + $0x50] sm:$0xff] (%p497_p13) }
  0x1c   : > { %487 = vst [vmem:[%s2777_s25 + $0x30] sm:$0xff] %v2592_v12  ;;  %2383 = vmatpush.msra.mxu2 (%p497_p13), %v517_v17  ;;  %2384 = vmatpush.msra.mxu3 (%p497_p13), %v517_v17  ;;  %v513_v21 = vld [vmem:[%s3635_s9 + $0x58] sm:$0xff] (%p497_p13)  ;;  %v511_v23 = vld [vmem:[%s3635_s9 + $0x48] sm:$0xff] (%p497_p13)  ;;  %v510_v24 = vld [vmem:[%s3635_s9 + $0x40] sm:$0xff] (%p497_p13) }
  0x1d   : > { %488 = vst [vmem:[%s2777_s25 + $0x38] sm:$0xff] %v2592_v12  ;;  %522 = vmatpush.msra.mxu0 (%p497_p13), %v517_v17  ;;  %2382 = vmatpush.msra.mxu1 (%p497_p13), %v517_v17  ;;  %v509_v25 = vld [vmem:[%s3635_s9 + $0x38] sm:$0xff] (%p497_p13)  ;;  %v508_v26 = vld [vmem:[%s3635_s9 + $0x30] sm:$0xff] (%p497_p13)  ;;  %v507_v27 = vld [vmem:[%s3635_s9 + $0x28] sm:$0xff] (%p497_p13) }
  0x1e   : > { %489 = vst [vmem:[%s2777_s25 + $0x40] sm:$0xff] %v2592_v12  ;;  %2386 = vmatpush.msra.mxu2 (%p497_p13), %v516_v18  ;;  %2387 = vmatpush.msra.mxu3 (%p497_p13), %v516_v18  ;;  %v506_v28 = vld [vmem:[%s3635_s9 + $0x20] sm:$0xff] (%p497_p13)  ;;  %v505_v29 = vld [vmem:[%s3635_s9 + $0x18] sm:$0xff] (%p497_p13)  ;;  %v504_v30 = vld [vmem:[%s3635_s9 + $0x10] sm:$0xff] (%p497_p13) }
  0x1f   : > { %490 = vst [vmem:[%s2777_s25 + $0x48] sm:$0xff] %v2592_v12  ;;  %523 = vmatpush.msra.mxu0 (%p497_p13), %v516_v18  ;;  %2385 = vmatpush.msra.mxu1 (%p497_p13), %v516_v18  ;;  %v503_v31 = vld [vmem:[%s3635_s9 + $0x8] sm:$0xff] (%p497_p13)  ;;  %v502_v32 = vld [vmem:[%s3635_s9] sm:$0xff] (%p497_p13) }
  0x20   : > { %491 = vst [vmem:[%s2777_s25 + $0x50] sm:$0xff] %v2592_v12  ;;  %2389 = vmatpush.msra.mxu2 (%p497_p13), %v515_v19  ;;  %2390 = vmatpush.msra.mxu3 (%p497_p13), %v515_v19  ;;  %v2506_v33 = vld [vmem:[%s3636_s10] ss:$0 sm:$0xff] (%p497_p13) }
  0x21   : > { %492 = vst [vmem:[%s2777_s25 + $0x58] sm:$0xff] %v2592_v12  ;;  %501 = sbr.rel (!%p497_p13) target bundleno = 219 (0xdb), region = 72  ;;  %524 = vmatpush.msra.mxu0 (%p497_p13), %v515_v19  ;;  %2388 = vmatpush.msra.mxu1 (%p497_p13), %v515_v19 }
  0x22   : > { %493 = vst [vmem:[%s2777_s25 + $0x60] sm:$0xff] %v2592_v12  ;;  %2392 = vmatpush.msra.mxu2 (%p497_p13), %v514_v20  ;;  %2393 = vmatpush.msra.mxu3 (%p497_p13), %v514_v20 }
  0x23   : > { %494 = vst [vmem:[%s2777_s25 + $0x68] sm:$0xff] %v2592_v12  ;;  %525 = vmatpush.msra.mxu0 (%p497_p13), %v514_v20  ;;  %2391 = vmatpush.msra.mxu1 (%p497_p13), %v514_v20 }
  0x24   : > { %495 = vst [vmem:[%s2777_s25 + $0x70] sm:$0xff] %v2592_v12  ;;  %2395 = vmatpush.msra.mxu2 (%p497_p13), %v513_v21  ;;  %2396 = vmatpush.msra.mxu3 (%p497_p13), %v513_v21 }
  0x25   : > { %496 = vst [vmem:[%s2777_s25 + $0x78] sm:$0xff] %v2592_v12  ;;  %526 = vmatpush.msra.mxu0 (%p497_p13), %v513_v21  ;;  %2394 = vmatpush.msra.mxu1 (%p497_p13), %v513_v21 }
  0x26   : > { %2398 = vmatpush.msra.mxu2 %v512_v22  ;;  %2399 = vmatpush.msra.mxu3 %v512_v22 }
  0x27   : > { %527 = vmatpush.msra.mxu0 %v512_v22  ;;  %2397 = vmatpush.msra.mxu1 %v512_v22 }
  0x28   : > { %2401 = vmatpush.msra.mxu2 %v511_v23  ;;  %2402 = vmatpush.msra.mxu3 %v511_v23 }
  0x29   : > { %528 = vmatpush.msra.mxu0 %v511_v23  ;;  %2400 = vmatpush.msra.mxu1 %v511_v23 }
  0x2a   : > { %2404 = vmatpush.msra.mxu2 %v510_v24  ;;  %2405 = vmatpush.msra.mxu3 %v510_v24 }
  0x2b   : > { %529 = vmatpush.msra.mxu0 %v510_v24  ;;  %2403 = vmatpush.msra.mxu1 %v510_v24 }
  0x2c   : > { %2407 = vmatpush.msra.mxu2 %v509_v25  ;;  %2408 = vmatpush.msra.mxu3 %v509_v25 }
  0x2d   : > { %530 = vmatpush.msra.mxu0 %v509_v25  ;;  %2406 = vmatpush.msra.mxu1 %v509_v25 }
  0x2e   : > { %2410 = vmatpush.msra.mxu2 %v508_v26  ;;  %2411 = vmatpush.msra.mxu3 %v508_v26 }
  0x2f   : > { %531 = vmatpush.msra.mxu0 %v508_v26  ;;  %2409 = vmatpush.msra.mxu1 %v508_v26 }
  0x30   : > { %2413 = vmatpush.msra.mxu2 %v507_v27  ;;  %2414 = vmatpush.msra.mxu3 %v507_v27 }
  0x31   : > { %532 = vmatpush.msra.mxu0 %v507_v27  ;;  %2412 = vmatpush.msra.mxu1 %v507_v27 }
  0x32   : > { %2416 = vmatpush.msra.mxu2 %v506_v28  ;;  %2417 = vmatpush.msra.mxu3 %v506_v28 }
  0x33   : > { %533 = vmatpush.msra.mxu0 %v506_v28  ;;  %2415 = vmatpush.msra.mxu1 %v506_v28 }
  0x34   : > { %2419 = vmatpush.msra.mxu2 %v505_v29  ;;  %2420 = vmatpush.msra.mxu3 %v505_v29 }
  0x35   : > { %534 = vmatpush.msra.mxu0 %v505_v29  ;;  %2418 = vmatpush.msra.mxu1 %v505_v29 }
  0x36   : > { %2422 = vmatpush.msra.mxu2 %v504_v30  ;;  %2423 = vmatpush.msra.mxu3 %v504_v30 }
  0x37   : > { %535 = vmatpush.msra.mxu0 %v504_v30  ;;  %2421 = vmatpush.msra.mxu1 %v504_v30 }
  0x38   : > { %2425 = vmatpush.msra.mxu2 %v503_v31  ;;  %2426 = vmatpush.msra.mxu3 %v503_v31 }
  0x39   : > { %536 = vmatpush.msra.mxu0 %v503_v31  ;;  %2424 = vmatpush.msra.mxu1 %v503_v31 }
  0x3a   : > { %2428 = vmatpush.msra.mxu2 %v502_v32  ;;  %2429 = vmatpush.msra.mxu3 %v502_v32 }
  0x3b   : > { %562 = vmatmul.f32.vlgmr.msra.gmra.mxu2 %v2760_v8  ;;  %574 = vmatmul.f32.vlgmr.msra.gmra.mxu3 %v2783_v13 }
  0x3c   : > { %537 = vmatpush.msra.mxu0 %v502_v32  ;;  %2427 = vmatpush.msra.mxu1 %v502_v32 }
  0x3d   : > { %538 = vmatmul.f32.vlgmr.msra.gmra.mxu0 %v2717_v0  ;;  %550 = vmatmul.f32.vlgmr.msra.gmra.mxu1 %v2739_v4 }
  0x43   : > { %565 = vmatmul.f32.gmra.mxu2 %v2765_v9  ;;  %577 = vmatmul.f32.gmra.mxu3 %v2788_v14 }
  0x45   : > { %541 = vmatmul.f32.gmra.mxu0 %v2722_v1  ;;  %553 = vmatmul.f32.gmra.mxu1 %v2744_v5 }
  0x4b   : > { %568 = vmatmul.f32.gmra.mxu2 %v2770_v10  ;;  %580 = vmatmul.f32.gmra.mxu3 %v2793_v15 }
  0x4d   : > { %544 = vmatmul.f32.gmra.mxu0 %v2727_v2  ;;  %556 = vmatmul.f32.gmra.mxu1 %v2750_v6 }
  0x53   : > { %571 = vmatmul.f32.gmra.mxu2 %v2775_v11  ;;  %583 = vmatmul.f32.gmra.mxu3 %v2800_v16 }
  0x55   : > { %547 = vmatmul.f32.gmra.mxu0 %v2734_v3  ;;  %559 = vmatmul.f32.gmra.mxu1 %v2755_v7 }
  0xba   : > { %v539_v34 = vpop.f32.mrf.mxu0  ;;  %v551_v35 = vpop.f32.mrf.mxu1 }
  0xbb   : > { %v540_v36 = vadd.f32 %v2506_v33, %v539_v34  ;;  %v552_v37 = vadd.f32 %v2506_v33, %v551_v35 }
  0xbd   : > { %587 = vst [vmem:[%s2777_s25] sm:$0xff] %v540_v36 }
  0xbe   : > { %591 = vst [vmem:[%s2777_s25 + $0x20] sm:$0xff] %v552_v37  ;;  %v563_v38 = vpop.f32.mrf.mxu2  ;;  %v575_v39 = vpop.f32.mrf.mxu3 }
  0xbf   : > { %v564_v40 = vadd.f32 %v2506_v33, %v563_v38  ;;  %v576_v41 = vadd.f32 %v2506_v33, %v575_v39 }
  0xc1   : > { %595 = vst [vmem:[%s2777_s25 + $0x40] sm:$0xff] %v564_v40 }
  0xc2   : > { %599 = vst [vmem:[%s2777_s25 + $0x60] sm:$0xff] %v576_v41  ;;  %v542_v42 = vpop.f32.mrf.mxu0  ;;  %v554_v43 = vpop.f32.mrf.mxu1 }
  0xc3   : > { %v543_v44 = vadd.f32 %v2506_v33, %v542_v42  ;;  %v555_v45 = vadd.f32 %v2506_v33, %v554_v43 }
  0xc5   : > { %588 = vst [vmem:[%s2777_s25 + $0x8] sm:$0xff] %v543_v44 }
  0xc6   : > { %592 = vst [vmem:[%s2777_s25 + $0x28] sm:$0xff] %v555_v45  ;;  %v566_v46 = vpop.f32.mrf.mxu2  ;;  %v578_v47 = vpop.f32.mrf.mxu3 }
  0xc7   : > { %v567_v48 = vadd.f32 %v2506_v33, %v566_v46  ;;  %v579_v49 = vadd.f32 %v2506_v33, %v578_v47 }
  0xc9   : > { %596 = vst [vmem:[%s2777_s25 + $0x48] sm:$0xff] %v567_v48 }
  0xca   : > { %600 = vst [vmem:[%s2777_s25 + $0x68] sm:$0xff] %v579_v49  ;;  %v545_v50 = vpop.f32.mrf.mxu0  ;;  %v557_v51 = vpop.f32.mrf.mxu1 }
  0xcb   : > { %v546_v52 = vadd.f32 %v2506_v33, %v545_v50  ;;  %v558_v53 = vadd.f32 %v2506_v33, %v557_v51 }
  0xcd   : > { %589 = vst [vmem:[%s2777_s25 + $0x10] sm:$0xff] %v546_v52 }
  0xce   : > { %593 = vst [vmem:[%s2777_s25 + $0x30] sm:$0xff] %v558_v53  ;;  %v569_v54 = vpop.f32.mrf.mxu2  ;;  %v581_v55 = vpop.f32.mrf.mxu3 }
  0xcf   : > { %v570_v56 = vadd.f32 %v2506_v33, %v569_v54  ;;  %v582_v57 = vadd.f32 %v2506_v33, %v581_v55 }
  0xd1   : > { %597 = vst [vmem:[%s2777_s25 + $0x50] sm:$0xff] %v570_v56 }
  0xd2   : > { %601 = vst [vmem:[%s2777_s25 + $0x70] sm:$0xff] %v582_v57  ;;  %v548_v58 = vpop.f32.mrf.mxu0  ;;  %v560_v59 = vpop.f32.mrf.mxu1 }
  0xd3   : > { %v549_v60 = vadd.f32 %v2506_v33, %v548_v58  ;;  %v561_v61 = vadd.f32 %v2506_v33, %v560_v59 }
  0xd5   : > { %590 = vst [vmem:[%s2777_s25 + $0x18] sm:$0xff] %v549_v60 }
  0xd6   : > { %594 = vst [vmem:[%s2777_s25 + $0x38] sm:$0xff] %v561_v61  ;;  %v572_v62 = vpop.f32.mrf.mxu2  ;;  %v584_v63 = vpop.f32.mrf.mxu3 }
  0xd7   : > { %v573_v12 = vadd.f32 %v2506_v33, %v572_v62  ;;  %v585_v17 = vadd.f32 %v2506_v33, %v584_v63 }
  0xd9   : > { %598 = vst [vmem:[%s2777_s25 + $0x58] sm:$0xff] %v573_v12 }
  0xda   : > { %602 = vst [vmem:[%s2777_s25 + $0x78] sm:$0xff] %v585_v17 }
  0xdb PF: > { %v846_v18 = vld [vmem:[%s2811_s23] sm:$0xff]  ;;  %v623_v20 = vld [vmem:[%s2806_s12 + $0x8] sm:$0xff]  ;;  %2430 = vmatpush.msra.mxu3 %v2800_v16  ;;  %1282 = vmatpush.msra.mxu1 %v2800_v16  ;;  %v2593_v21 = vmov 0   ;;  %v628_v25 = vld [vmem:[%s2806_s12 + $0x30] sm:$0xff]  ;;  %v603_v47 = vlaneseq  ;;  %v2594_v56 = vmov 1.0   ;;  %s3646_s15 = scalar_lea.vmem %s3627_s1, %s3660_s24  ;;  %s2381_s24 = sshll.u32 %s2582_s20, 7 }
  0xdc   : > { %v638_v19 = vld [vmem:[%s2806_s12 + $0x80] sm:$0xff]  ;;  %2509 = vset.pattern.permute.xlu2 %v2593_v21  ;;  %2508 = vset.pattern.permute.xlu1 %v2593_v21  ;;  %v639_v22 = vld [vmem:[%s2806_s12 + $0x88] sm:$0xff]  ;;  %v644_v26 = vld [vmem:[%s2806_s12 + $0xb0] sm:$0xff]  ;;  %s2076_s28 = scalar_lea.hbm %s3637_s11, %s2381_s24  ;;  %s2077_s13 = sshll.u32 %s2777_s25, 4  ;;  %s2078_s13 = int_to_ptr.vmem [resolvable:$true] %s2077_s13 }
  0xdd   : > { %2507 = vset.pattern.permute.xlu0 %v2593_v21  ;;  %879 = vperm.xlu1 %2508, %v846_v18   ;;  %v847_v23 = vld [vmem:[%s2811_s23 + $0x8] sm:$0xff]  ;;  %v622_v24 = vld [vmem:[%s2806_s12] sm:$0xff]  ;;  %v853_v27 = vld [vmem:[%s2811_s23 + $0x38] sm:$0xff]  ;;  %v3011_v52 = vand.u32 127, %v603_v47  ;;  %s2079_s26 = sshll.u32 %s2076_s28, 4  ;;  %s3647_s30 = sand.u32 1, %s2574_s18   ;;  %s2080_s26 = int_to_ptr.hbm [resolvable:$true] %s2079_s26 }
  0xde   : > { %703 = vperm.xlu0 %2507, %v638_v19   ;;  %658 = vperm.xlu2 %2509, %v623_v20   ;;  %v630_v28 = vld [vmem:[%s2806_s12 + $0x40] sm:$0xff]  ;;  %v631_v30 = vld [vmem:[%s2806_s12 + $0x48] sm:$0xff]  ;;  %v632_v33 = vld [vmem:[%s2806_s12 + $0x50] sm:$0xff]  ;;  %s2065_s14 = scalar_lea.sflag [#allocation3], %s3647_s30  ;;  %s2526_s20 = sshra.s32 %s2080_s26, 4  ;;  %s2527_s20 = int_to_ptr.hbm [resolvable:$true] %s2526_s20 }
  0xdf   : > { %2431 = vmatpush.msra.mxu3 %v2793_v15  ;;  %1283 = vmatpush.msra.mxu1 %v2793_v15  ;;  %v646_v29 = vld [vmem:[%s2806_s12 + $0xc0] sm:$0xff]  ;;  %v855_v31 = vld [vmem:[%s2811_s23 + $0x48] sm:$0xff]  ;;  %v856_v34 = vld [vmem:[%s2811_s23 + $0x50] sm:$0xff]  ;;  %s2532_s24 = scalar_lea.hbm %s3637_s11, 256  ;;  %p2533_p3 = scmp.lt.s32.totalorder %s2527_s20, %s3637_s11 }
  0xe0   : > { %1169 = vmatpush.msra.mxu0 %v2800_v16  ;;  %v640_v16 = vld [vmem:[%s2806_s12 + $0x90] sm:$0xff]  ;;  %v647_v32 = vld [vmem:[%s2806_s12 + $0xc8] sm:$0xff]  ;;  %v633_v36 = vld [vmem:[%s2806_s12 + $0x58] sm:$0xff] }
  0xe1   : > { %2432 = vmatpush.msra.mxu3 %v2788_v14  ;;  %1284 = vmatpush.msra.mxu1 %v2788_v14  ;;  %v648_v35 = vld [vmem:[%s2806_s12 + $0xd0] sm:$0xff]  ;;  %v857_v37 = vld [vmem:[%s2811_s23 + $0x58] sm:$0xff]  ;;  %v634_v40 = vld [vmem:[%s2806_s12 + $0x60] sm:$0xff] }
  0xe2   : > { %1170 = vmatpush.msra.mxu0 %v2793_v15  ;;  %v624_v15 = vld [vmem:[%s2806_s12 + $0x10] sm:$0xff]  ;;  %v649_v38 = vld [vmem:[%s2806_s12 + $0xd8] sm:$0xff]  ;;  %v858_v41 = vld [vmem:[%s2811_s23 + $0x60] sm:$0xff] }
  0xe3   : > { %2433 = vmatpush.msra.mxu3 %v2783_v13  ;;  %1285 = vmatpush.msra.mxu1 %v2783_v13  ;;  %v650_v42 = vld [vmem:[%s2806_s12 + $0xe0] sm:$0xff]  ;;  %v635_v44 = vld [vmem:[%s2806_s12 + $0x68] sm:$0xff]  ;;  %v636_v49 = vld [vmem:[%s2806_s12 + $0x70] sm:$0xff] }
  0xe4   : > { %1171 = vmatpush.msra.mxu0 %v2788_v14  ;;  %v848_v14 = vld [vmem:[%s2811_s23 + $0x10] sm:$0xff]  ;;  %v859_v45 = vld [vmem:[%s2811_s23 + $0x68] sm:$0xff]  ;;  %v637_v57 = vld [vmem:[%s2806_s12 + $0x78] sm:$0xff] }
  0xe5   : > { %706 = vperm.xlu1 %2508, %v639_v22   ;;  %2434 = vmatpush.msra.mxu3 %v2775_v11  ;;  %v651_v46 = vld [vmem:[%s2806_s12 + $0xe8] sm:$0xff]  ;;  %v860_v50 = vld [vmem:[%s2811_s23 + $0x70] sm:$0xff]  ;;  %v861_v58 = vld [vmem:[%s2811_s23 + $0x78] sm:$0xff] }
  0xe6   : > { %882 = vperm.xlu2 %2509, %v847_v23   ;;  %655 = vperm.xlu0 %2507, %v622_v24   ;;  %v652_v51 = vld [vmem:[%s2806_s12 + $0xf0] sm:$0xff]  ;;  %v653_v59 = vld [vmem:[%s2806_s12 + $0xf8] sm:$0xff]  ;;  %v863_v63 = vld [vmem:[%s2811_s23 + $0x88] sm:$0xff] }
  0xe7   : > { %1286 = vmatpush.msra.mxu1 %v2775_v11  ;;  %2435 = vmatpush.msra.mxu3 %v2770_v10  ;;  %v864_v12 = vld [vmem:[%s2811_s23 + $0x90] sm:$0xff]  ;;  %v862_v17 = vld [vmem:[%s2811_s23 + $0x80] sm:$0xff]  ;;  %v867_v22 = vld [vmem:[%s2811_s23 + $0xa8] sm:$0xff] }
  0xe8   : > { %1172 = vmatpush.msra.mxu0 %v2783_v13  ;;  %v641_v13 = vld [vmem:[%s2806_s12 + $0x98] sm:$0xff]  ;;  %v866_v21 = vld [vmem:[%s2811_s23 + $0xa0] sm:$0xff] }
  0xe9   : > { %1287 = vmatpush.msra.mxu1 %v2770_v10  ;;  %2436 = vmatpush.msra.mxu3 %v2765_v9  ;;  %v865_v23 = vld [vmem:[%s2811_s23 + $0x98] sm:$0xff] }
  0xea   : > { %1173 = vmatpush.msra.mxu0 %v2775_v11  ;;  %v625_v11 = vld [vmem:[%s2806_s12 + $0x18] sm:$0xff] }
  0xeb   : > { %1288 = vmatpush.msra.mxu1 %v2765_v9  ;;  %2437 = vmatpush.msra.mxu3 %v2760_v8 }
  0xec   : > { %1174 = vmatpush.msra.mxu0 %v2770_v10  ;;  %v849_v10 = vld [vmem:[%s2811_s23 + $0x18] sm:$0xff] }
  0xed   : > { %661 = vperm.xlu1 %2508, %v624_v15   ;;  %1289 = vmatpush.msra.mxu1 %v2760_v8 }
  0xee   : > { %885 = vperm.xlu2 %2509, %v848_v14   ;;  %709 = vperm.xlu0 %2507, %v640_v16   ;;  %v869_v14 = vld [vmem:[%s2811_s23 + $0xb8] sm:$0xff] }
  0xef   : > { %2438 = vmatpush.msra.mxu3 %v2755_v7  ;;  %1290 = vmatpush.msra.mxu1 %v2755_v7 }
  0xf0   : > { %1175 = vmatpush.msra.mxu0 %v2765_v9  ;;  %v642_v9 = vld [vmem:[%s2806_s12 + $0xa0] sm:$0xff] }
  0xf1   : > { %2439 = vmatpush.msra.mxu3 %v2750_v6  ;;  %1291 = vmatpush.msra.mxu1 %v2750_v6 }
  0xf2   : > { %1176 = vmatpush.msra.mxu0 %v2760_v8  ;;  %v626_v8 = vld [vmem:[%s2806_s12 + $0x20] sm:$0xff] }
  0xf3   : > { %2440 = vmatpush.msra.mxu3 %v2744_v5  ;;  %1292 = vmatpush.msra.mxu1 %v2744_v5 }
  0xf4   : > { %1177 = vmatpush.msra.mxu0 %v2755_v7  ;;  %v850_v7 = vld [vmem:[%s2811_s23 + $0x20] sm:$0xff] }
  0xf5   : > { %664 = vperm.xlu1 %2508, %v625_v11   ;;  %2441 = vmatpush.msra.mxu3 %v2739_v4  ;;  %v870_v11 = vld [vmem:[%s2811_s23 + $0xc0] sm:$0xff] }
  0xf6   : > { %888 = vperm.xlu2 %2509, %v849_v10   ;;  %712 = vperm.xlu0 %2507, %v641_v13   ;;  %v868_v10 = vld [vmem:[%s2811_s23 + $0xb0] sm:$0xff] }
  0xf7   : > { %1293 = vmatpush.msra.mxu1 %v2739_v4  ;;  %2442 = vmatpush.msra.mxu3 %v2734_v3 }
  0xf8   : > { %1178 = vmatpush.msra.mxu0 %v2750_v6  ;;  %v643_v6 = vld [vmem:[%s2806_s12 + $0xa8] sm:$0xff] }
  0xf9   : > { %1294 = vmatpush.msra.mxu1 %v2734_v3  ;;  %2443 = vmatpush.msra.mxu3 %v2727_v2 }
  0xfa   : > { %1179 = vmatpush.msra.mxu0 %v2744_v5  ;;  %v627_v5 = vld [vmem:[%s2806_s12 + $0x28] sm:$0xff] }
  0xfb   : > { %1295 = vmatpush.msra.mxu1 %v2727_v2  ;;  %2444 = vmatpush.msra.mxu3 %v2722_v1 }
  0xfc   : > { %1180 = vmatpush.msra.mxu0 %v2739_v4  ;;  %v851_v4 = vld [vmem:[%s2811_s23 + $0x28] sm:$0xff] }
  0xfd   : > { %667 = vperm.xlu1 %2508, %v626_v8   ;;  %1296 = vmatpush.msra.mxu1 %v2722_v1 }
  0xfe   : > { %891 = vperm.xlu2 %2509, %v850_v7   ;;  %715 = vperm.xlu0 %2507, %v642_v9   ;;  %v872_v7 = vld [vmem:[%s2811_s23 + $0xd0] sm:$0xff]  ;;  %v873_v9 = vld [vmem:[%s2811_s23 + $0xd8] sm:$0xff] }
  0xff   : > { %2445 = vmatpush.msra.mxu3 %v2717_v0  ;;  %1297 = vmatpush.msra.mxu1 %v2717_v0 }
 0x100   : > { %1181 = vmatpush.msra.mxu0 %v2734_v3  ;;  %v852_v3 = vld [vmem:[%s2811_s23 + $0x30] sm:$0xff] }
 0x102   : > { %1182 = vmatpush.msra.mxu0 %v2727_v2  ;;  %v629_v2 = vld [vmem:[%s2806_s12 + $0x38] sm:$0xff] }
 0x104   : > { %1183 = vmatpush.msra.mxu0 %v2722_v1  ;;  %v645_v1 = vld [vmem:[%s2806_s12 + $0xb8] sm:$0xff]  ;;  %s2528_s12 = scalar_lea.hbm %s2527_s20, 128 }
 0x105   : > { %670 = vperm.xlu1 %2508, %v627_v5   ;;  %v871_v5 = vld [vmem:[%s2811_s23 + $0xc8] sm:$0xff]  ;;  %p2529_p0 = scmp.ne.s32.totalorder %s2527_s20, %s2528_s12  ;;  %p2534_p5 = scmp.lt.s32.totalorder %s2532_s24, %s2528_s12 }
 0x106   : > { %894 = vperm.xlu2 %2509, %v851_v4   ;;  %718 = vperm.xlu0 %2507, %v643_v6  }
 0x107   : > { %1184 = vmatpush.msra.mxu0 %v2717_v0  ;;  %v854_v0 = vld [vmem:[%s2811_s23 + $0x40] sm:$0xff]  ;;  %p2530_p1 = pnand %p2529_p0, %p2697_p4  ;;  %p2535_p6 = por %p2534_p5, %p2533_p3 }
 0x109   : > { %p2531_p2 = pneg %p2530_p1 }
 0x10b   : > { %p2536_p7 = pnand %p2535_p6, %p2531_p2 }
 0x10d   : > { %673 = vperm.xlu1 %2508, %v628_v25  }
 0x10e   : > { %897 = vperm.xlu2 %2509, %v852_v3   ;;  %721 = vperm.xlu0 %2507, %v644_v26   ;;  %v875_v3 = vld [vmem:[%s2811_s23 + $0xe8] sm:$0xff]  ;;  %v876_v26 = vld [vmem:[%s2811_s23 + $0xf0] sm:$0xff] }
 0x115   : > { %676 = vperm.xlu1 %2508, %v629_v2   ;;  %v874_v2 = vld [vmem:[%s2811_s23 + $0xe0] sm:$0xff] }
 0x116   : > { %900 = vperm.xlu2 %2509, %v853_v27   ;;  %724 = vperm.xlu0 %2507, %v645_v1  }
 0x11d   : > { %679 = vperm.xlu1 %2508, %v630_v28  }
 0x11e   : > { %903 = vperm.xlu2 %2509, %v854_v0   ;;  %727 = vperm.xlu0 %2507, %v646_v29   ;;  %v877_v0 = vld [vmem:[%s2811_s23 + $0xf8] sm:$0xff] }
 0x125   : > { %682 = vperm.xlu1 %2508, %v631_v30  }
 0x126   : > { %906 = vperm.xlu2 %2509, %v855_v31   ;;  %730 = vperm.xlu0 %2507, %v647_v32  }
 0x12d   : > { %685 = vperm.xlu1 %2508, %v632_v33  }
 0x12e   : > { %909 = vperm.xlu2 %2509, %v856_v34   ;;  %733 = vperm.xlu0 %2507, %v648_v35   ;;  %v1426_v34 = vld [vmem:[%s3631_s5 + $0x78] sm:$0xff]  ;;  %v1425_v35 = vld [vmem:[%s3631_s5 + $0x70] sm:$0xff] }
 0x12f   : > { %1427 = vmatpush.msra.mxu2 %v1426_v34 }
 0x131   : > { %1428 = vmatpush.msra.mxu2 %v1425_v35 }
 0x135   : > { %688 = vperm.xlu1 %2508, %v633_v36   ;;  %v1424_v36 = vld [vmem:[%s3631_s5 + $0x68] sm:$0xff] }
 0x136   : > { %912 = vperm.xlu2 %2509, %v857_v37   ;;  %736 = vperm.xlu0 %2507, %v649_v38   ;;  %v1423_v38 = vld [vmem:[%s3631_s5 + $0x60] sm:$0xff] }
 0x137   : > { %1429 = vmatpush.msra.mxu2 %v1424_v36 }
 0x138   : > { %v659_v39 = vpop.permute.xlu2 %658 }
 0x139   : > { %vm751_vm6 = vcmp.eq.s32.totalorder %v659_v39, %v3011_v52  ;;  %1430 = vmatpush.msra.mxu2 %v1423_v38 }
 0x13d   : > { %691 = vperm.xlu1 %2508, %v634_v40  }
 0x13e   : > { %915 = vperm.xlu2 %2509, %v858_v41   ;;  %739 = vperm.xlu0 %2507, %v650_v42   ;;  %v1422_v41 = vld [vmem:[%s3631_s5 + $0x58] sm:$0xff] }
 0x13f   : > { %v1410_v42 = vld [vmem:[%s3630_s4 + $0x78] sm:$0xff]  ;;  %1431 = vmatpush.msra.mxu2 %v1422_v41 }
 0x140   : > { %v883_v43 = vpop.permute.xlu2 %882  ;;  %1540 = vmatpush.msrb.mxu3 %v1410_v42 }
 0x141   : > { %vm975_vm2 = vcmp.eq.s32.totalorder %v883_v43, %v3011_v52  ;;  %v1421_v43 = vld [vmem:[%s3631_s5 + $0x50] sm:$0xff] }
 0x142   : > { %1432 = vmatpush.msra.mxu2 %v1421_v43 }
 0x145   : > { %694 = vperm.xlu1 %2508, %v635_v44   ;;  %v1409_v44 = vld [vmem:[%s3630_s4 + $0x70] sm:$0xff] }
 0x146   : > { %918 = vperm.xlu2 %2509, %v859_v45   ;;  %742 = vperm.xlu0 %2507, %v651_v46   ;;  %v1420_v45 = vld [vmem:[%s3631_s5 + $0x48] sm:$0xff] }
 0x147   : > { %v1408_v46 = vld [vmem:[%s3630_s4 + $0x68] sm:$0xff]  ;;  %1541 = vmatpush.msrb.mxu3 %v1409_v44  ;;  %1433 = vmatpush.msra.mxu2 %v1420_v45 }
 0x148   : > { %v886_v48 = vpop.permute.xlu2 %885 }
 0x149   : > { %vm976_vm5 = vcmp.eq.s32.totalorder %v886_v48, %v3011_v52  ;;  %v1419_v48 = vld [vmem:[%s3631_s5 + $0x40] sm:$0xff]  ;;  %1542 = vmatpush.msrb.mxu3 %v1408_v46 }
 0x14a   : > { %1434 = vmatpush.msra.mxu2 %v1419_v48 }
 0x14d   : > { %697 = vperm.xlu1 %2508, %v636_v49  }
 0x14e   : > { %921 = vperm.xlu2 %2509, %v860_v50   ;;  %745 = vperm.xlu0 %2507, %v652_v51   ;;  %v1407_v50 = vld [vmem:[%s3630_s4 + $0x60] sm:$0xff] }
 0x14f   : > { %v880_v53 = vpop.permute.xlu1 %879  ;;  %1543 = vmatpush.msrb.mxu3 %v1407_v50 }
 0x150   : > { %vm974_vm0 = vcmp.eq.s32.totalorder %v880_v53, %v3011_v52  ;;  %v704_v54 = vpop.permute.xlu0 %703  ;;  %v889_v55 = vpop.permute.xlu2 %888 }
 0x151   : > { %vm766_vm1 = vcmp.eq.s32.totalorder %v704_v54, %v3011_v52  ;;  %2311 = vmatmul.msk.f32.vlgmr.msra.gmra.mxu1 %vm974_vm0, %v2594_v56  ;;  %vm977_vm8 = vcmp.eq.s32.totalorder %v889_v55, %v3011_v52  ;;  %v1418_v54 = vld [vmem:[%s3631_s5 + $0x38] sm:$0xff] }
 0x152   : > { %2295 = vmatmul.msk.f32.vlgmr.msra.gmra.mxu3 %vm766_vm1, %v2594_v56  ;;  %v1406_v55 = vld [vmem:[%s3630_s4 + $0x58] sm:$0xff]  ;;  %1435 = vmatpush.msra.mxu2 %v1418_v54 }
 0x153   : > { %1544 = vmatpush.msrb.mxu3 %v1406_v55 }
 0x155   : > { %700 = vperm.xlu1 %2508, %v637_v57   ;;  %v1417_v57 = vld [vmem:[%s3631_s5 + $0x30] sm:$0xff] }
 0x156   : > { %924 = vperm.xlu2 %2509, %v861_v58   ;;  %748 = vperm.xlu0 %2507, %v653_v59   ;;  %v1405_v58 = vld [vmem:[%s3630_s4 + $0x50] sm:$0xff]  ;;  %v1416_v59 = vld [vmem:[%s3631_s5 + $0x28] sm:$0xff] }
 0x157   : > { %v707_v60 = vpop.permute.xlu1 %706  ;;  %1436 = vmatpush.msra.mxu2 %v1417_v57  ;;  %1545 = vmatpush.msrb.mxu3 %v1405_v58 }
 0x158   : > { %vm767_vm3 = vcmp.eq.s32.totalorder %v707_v60, %v3011_v52  ;;  %v892_v61 = vpop.permute.xlu2 %891  ;;  %v656_v62 = vpop.permute.xlu0 %655  ;;  %v1404_v60 = vld [vmem:[%s3630_s4 + $0x48] sm:$0xff] }
 0x159   : > { %vm750_vm4 = vcmp.eq.s32.totalorder %v656_v62, %v3011_v52  ;;  %2312 = vmatmul.msk.f32.gmra.mxu1 %vm975_vm2, %v2594_v56  ;;  %vm978_vm11 = vcmp.eq.s32.totalorder %v892_v61, %v3011_v52  ;;  %v1415_v61 = vld [vmem:[%s3631_s5 + $0x20] sm:$0xff]  ;;  %1437 = vmatpush.msra.mxu2 %v1416_v59 }
 0x15a   : > { %2279 = vmatmul.msk.f32.vlgmr.msra.gmra.mxu0 %vm750_vm4, %v2594_v56  ;;  %2296 = vmatmul.msk.f32.gmra.mxu3 %vm767_vm3, %v2594_v56 }
 0x15b   : > { %1546 = vmatpush.msrb.mxu3 %v1404_v60  ;;  %1438 = vmatpush.msra.mxu2 %v1415_v61 }
 0x15d   : > { %930 = vperm.xlu1 %2508, %v863_v63  }
 0x15e   : > { %933 = vperm.xlu2 %2509, %v864_v12   ;;  %927 = vperm.xlu0 %2507, %v862_v17   ;;  %v1403_v17 = vld [vmem:[%s3630_s4 + $0x40] sm:$0xff] }
 0x15f   : > { %v662_v18 = vpop.permute.xlu1 %661  ;;  %1547 = vmatpush.msrb.mxu3 %v1403_v17 }
 0x160   : > { %v710_v19 = vpop.permute.xlu0 %709  ;;  %v895_v20 = vpop.permute.xlu2 %894  ;;  %vm752_vm9 = vcmp.eq.s32.totalorder %v662_v18, %v3011_v52  ;;  %v1414_v18 = vld [vmem:[%s3631_s5 + $0x18] sm:$0xff] }
 0x161   : > { %vm768_vm7 = vcmp.eq.s32.totalorder %v710_v19, %v3011_v52  ;;  %2313 = vmatmul.msk.f32.gmra.mxu1 %vm976_vm5, %v2594_v56  ;;  %vm979_vm14 = vcmp.eq.s32.totalorder %v895_v20, %v3011_v52  ;;  %v1402_v19 = vld [vmem:[%s3630_s4 + $0x38] sm:$0xff]  ;;  %v1413_v20 = vld [vmem:[%s3631_s5 + $0x10] sm:$0xff]  ;;  %1439 = vmatpush.msra.mxu2 %v1414_v18 }
 0x162   : > { %2280 = vmatmul.msk.f32.gmra.mxu0 %vm751_vm6, %v2594_v56  ;;  %2297 = vmatmul.msk.f32.gmra.mxu3 %vm768_vm7, %v2594_v56 }
 0x163   : > { %1548 = vmatpush.msrb.mxu3 %v1402_v19  ;;  %1440 = vmatpush.msra.mxu2 %v1413_v20 }
 0x165   : > { %939 = vperm.xlu1 %2508, %v866_v21   ;;  %v1401_v21 = vld [vmem:[%s3630_s4 + $0x30] sm:$0xff] }
 0x166   : > { %942 = vperm.xlu2 %2509, %v867_v22   ;;  %936 = vperm.xlu0 %2507, %v865_v23   ;;  %v1412_v22 = vld [vmem:[%s3631_s5 + $0x8] sm:$0xff] }
 0x167   : > { %v665_v24 = vpop.permute.xlu1 %664  ;;  %v1400_v23 = vld [vmem:[%s3630_s4 + $0x28] sm:$0xff]  ;;  %1549 = vmatpush.msrb.mxu3 %v1401_v21  ;;  %1441 = vmatpush.msra.mxu2 %v1412_v22  ;;  %v1736_v22 = vld [vmem:[%s3633_s7 + $0x78] sm:$0xff] }
 0x168   : > { %v713_v15 = vpop.permute.xlu0 %712  ;;  %v898_v16 = vpop.permute.xlu2 %897  ;;  %vm753_vm12 = vcmp.eq.s32.totalorder %v665_v24, %v3011_v52  ;;  %1741 = vmatpush.msrb.mxu0 %v1736_v22 }
 0x169   : > { %vm769_vm10 = vcmp.eq.s32.totalorder %v713_v15, %v3011_v52  ;;  %2314 = vmatmul.msk.f32.gmra.mxu1 %vm977_vm8, %v2594_v56  ;;  %vm980_vm1 = vcmp.eq.s32.totalorder %v898_v16, %v3011_v52  ;;  %v1399_v16 = vld [vmem:[%s3630_s4 + $0x20] sm:$0xff]  ;;  %1550 = vmatpush.msrb.mxu3 %v1400_v23  ;;  %v1735_v23 = vld [vmem:[%s3633_s7 + $0x70] sm:$0xff] }
 0x16a   : > { %2281 = vmatmul.msk.f32.gmra.mxu0 %vm752_vm9, %v2594_v56  ;;  %2298 = vmatmul.msk.f32.gmra.mxu3 %vm769_vm10, %v2594_v56 }
 0x16b   : > { %1551 = vmatpush.msrb.mxu3 %v1399_v16  ;;  %1742 = vmatpush.msrb.mxu0 %v1735_v23  ;;  %v1734_v16 = vld [vmem:[%s3633_s7 + $0x68] sm:$0xff] }
 0x16d   : > { %948 = vperm.xlu1 %2508, %v869_v14   ;;  %v1411_v14 = vld [vmem:[%s3631_s5] sm:$0xff]  ;;  %1743 = vmatpush.msrb.mxu0 %v1734_v16 }
 0x16e   : > { %951 = vperm.xlu2 %2509, %v870_v11   ;;  %945 = vperm.xlu0 %2507, %v868_v10   ;;  %v1398_v10 = vld [vmem:[%s3630_s4 + $0x18] sm:$0xff] }
 0x16f   : > { %v668_v13 = vpop.permute.xlu1 %667  ;;  %1442 = vmatpush.msra.mxu2 %v1411_v14  ;;  %1552 = vmatpush.msrb.mxu3 %v1398_v10  ;;  %v1733_v10 = vld [vmem:[%s3633_s7 + $0x60] sm:$0xff] }
 0x170   : > { %v716_v8 = vpop.permute.xlu0 %715  ;;  %v901_v4 = vpop.permute.xlu2 %900  ;;  %vm754_vm15 = vcmp.eq.s32.totalorder %v668_v13, %v3011_v52  ;;  %v1397_v13 = vld [vmem:[%s3630_s4 + $0x10] sm:$0xff]  ;;  %1744 = vmatpush.msrb.mxu0 %v1733_v10 }
 0x171   : > { %vm770_vm13 = vcmp.eq.s32.totalorder %v716_v8, %v3011_v52  ;;  %2315 = vmatmul.msk.f32.gmra.mxu1 %vm978_vm11, %v2594_v56  ;;  %vm981_vm4 = vcmp.eq.s32.totalorder %v901_v4, %v3011_v52  ;;  %v1396_v8 = vld [vmem:[%s3630_s4 + $0x8] sm:$0xff]  ;;  %1553 = vmatpush.msrb.mxu3 %v1397_v13  ;;  %v1732_v13 = vld [vmem:[%s3633_s7 + $0x58] sm:$0xff] }
 0x172   : > { %2282 = vmatmul.msk.f32.gmra.mxu0 %vm753_vm12, %v2594_v56  ;;  %2299 = vmatmul.msk.f32.gmra.mxu3 %vm770_vm13, %v2594_v56 }
 0x173   : > { %1554 = vmatpush.msrb.mxu3 %v1396_v8  ;;  %1745 = vmatpush.msrb.mxu0 %v1732_v13  ;;  %v1731_v8 = vld [vmem:[%s3633_s7 + $0x50] sm:$0xff] }
 0x175   : > { %957 = vperm.xlu1 %2508, %v872_v7   ;;  %1746 = vmatpush.msrb.mxu0 %v1731_v8 }
 0x176   : > { %960 = vperm.xlu2 %2509, %v873_v9   ;;  %954 = vperm.xlu0 %2507, %v871_v5   ;;  %v1395_v5 = vld [vmem:[%s3630_s4] sm:$0xff] }
 0x177   : > { %v671_v6 = vpop.permute.xlu1 %670  ;;  %1555 = vmatpush.msrb.mxu3 %v1395_v5 }
 0x178   : > { %v719_v25 = vpop.permute.xlu0 %718  ;;  %v904_v27 = vpop.permute.xlu2 %903  ;;  %vm755_vm2 = vcmp.eq.s32.totalorder %v671_v6, %v3011_v52 }
 0x179   : > { %vm771_vm0 = vcmp.eq.s32.totalorder %v719_v25, %v3011_v52  ;;  %2316 = vmatmul.msk.f32.gmra.mxu1 %vm979_vm14, %v2594_v56  ;;  %vm982_vm7 = vcmp.eq.s32.totalorder %v904_v27, %v3011_v52 }
 0x17a   : > { %2283 = vmatmul.msk.f32.gmra.mxu0 %vm754_vm15, %v2594_v56  ;;  %2300 = vmatmul.msk.f32.gmra.mxu3 %vm771_vm0, %v2594_v56 }
 0x17d   : > { %966 = vperm.xlu1 %2508, %v875_v3  }
 0x17e   : > { %969 = vperm.xlu2 %2509, %v876_v26   ;;  %963 = vperm.xlu0 %2507, %v874_v2  }
 0x17f   : > { %v674_v1 = vpop.permute.xlu1 %673 }
 0x180   : > { %v722_v28 = vpop.permute.xlu0 %721  ;;  %vm756_vm5 = vcmp.eq.s32.totalorder %v674_v1, %v3011_v52  ;;  %v907_v31 = vpop.permute.xlu2 %906 }
 0x181   : > { %vm772_vm3 = vcmp.eq.s32.totalorder %v722_v28, %v3011_v52  ;;  %2317 = vmatmul.msk.f32.gmra.mxu1 %vm980_vm1, %v2594_v56  ;;  %vm983_vm10 = vcmp.eq.s32.totalorder %v907_v31, %v3011_v52 }
 0x182   : > { %2284 = vmatmul.msk.f32.gmra.mxu0 %vm755_vm2, %v2594_v56  ;;  %2301 = vmatmul.msk.f32.gmra.mxu3 %vm772_vm3, %v2594_v56 }
 0x186   : > { %972 = vperm.xlu0 %2507, %v877_v0  }
 0x187   : > { %v677_v29 = vpop.permute.xlu1 %676 }
 0x188   : > { %v725_v30 = vpop.permute.xlu0 %724  ;;  %vm757_vm8 = vcmp.eq.s32.totalorder %v677_v29, %v3011_v52  ;;  %v910_v37 = vpop.permute.xlu2 %909 }
 0x189   : > { %vm773_vm6 = vcmp.eq.s32.totalorder %v725_v30, %v3011_v52  ;;  %2318 = vmatmul.msk.f32.gmra.mxu1 %vm981_vm4, %v2594_v56  ;;  %vm984_vm13 = vcmp.eq.s32.totalorder %v910_v37, %v3011_v52 }
 0x18a   : > { %2285 = vmatmul.msk.f32.gmra.mxu0 %vm756_vm5, %v2594_v56  ;;  %2302 = vmatmul.msk.f32.gmra.mxu3 %vm773_vm6, %v2594_v56 }
 0x18f   : > { %v680_v32 = vpop.permute.xlu1 %679 }
 0x190   : > { %v728_v33 = vpop.permute.xlu0 %727  ;;  %vm758_vm11 = vcmp.eq.s32.totalorder %v680_v32, %v3011_v52  ;;  %v913_v49 = vpop.permute.xlu2 %912 }
 0x191   : > { %vm774_vm9 = vcmp.eq.s32.totalorder %v728_v33, %v3011_v52  ;;  %2319 = vmatmul.msk.f32.gmra.mxu1 %vm982_vm7, %v2594_v56  ;;  %vm985_vm0 = vcmp.eq.s32.totalorder %v913_v49, %v3011_v52 }
 0x192   : > { %2286 = vmatmul.msk.f32.gmra.mxu0 %vm757_vm8, %v2594_v56  ;;  %2303 = vmatmul.msk.f32.gmra.mxu3 %vm774_vm9, %v2594_v56 }
 0x197   : > { %v683_v39 = vpop.permute.xlu1 %682 }
 0x198   : > { %v731_v40 = vpop.permute.xlu0 %730  ;;  %vm759_vm14 = vcmp.eq.s32.totalorder %v683_v39, %v3011_v52  ;;  %v916_v62 = vpop.permute.xlu2 %915 }
 0x199   : > { %vm775_vm12 = vcmp.eq.s32.totalorder %v731_v40, %v3011_v52  ;;  %2320 = vmatmul.msk.f32.gmra.mxu1 %vm983_vm10, %v2594_v56  ;;  %vm986_vm3 = vcmp.eq.s32.totalorder %v916_v62, %v3011_v52 }
 0x19a   : > { %2287 = vmatmul.msk.f32.gmra.mxu0 %vm758_vm11, %v2594_v56  ;;  %2304 = vmatmul.msk.f32.gmra.mxu3 %vm775_vm12, %v2594_v56 }
 0x19f   : > { %v686_v51 = vpop.permute.xlu1 %685 }
 0x1a0   : > { %v734_v53 = vpop.permute.xlu0 %733  ;;  %vm760_vm1 = vcmp.eq.s32.totalorder %v686_v51, %v3011_v52  ;;  %v919_v11 = vpop.permute.xlu2 %918 }
 0x1a1   : > { %vm776_vm15 = vcmp.eq.s32.totalorder %v734_v53, %v3011_v52  ;;  %2321 = vmatmul.msk.f32.gmra.mxu1 %vm984_vm13, %v2594_v56  ;;  %vm987_vm6 = vcmp.eq.s32.totalorder %v919_v11, %v3011_v52 }
 0x1a2   : > { %2288 = vmatmul.msk.f32.gmra.mxu0 %vm759_vm14, %v2594_v56  ;;  %2305 = vmatmul.msk.f32.gmra.mxu3 %vm776_vm15, %v2594_v56 }
 0x1a7   : > { %v689_v63 = vpop.permute.xlu1 %688 }
 0x1a8   : > { %v737_v12 = vpop.permute.xlu0 %736  ;;  %vm761_vm4 = vcmp.eq.s32.totalorder %v689_v63, %v3011_v52  ;;  %v922_v4 = vpop.permute.xlu2 %921 }
 0x1a9   : > { %vm777_vm2 = vcmp.eq.s32.totalorder %v737_v12, %v3011_v52  ;;  %2322 = vmatmul.msk.f32.gmra.mxu1 %vm985_vm0, %v2594_v56  ;;  %vm988_vm9 = vcmp.eq.s32.totalorder %v922_v4, %v3011_v52  ;;  %v1730_v4 = vld [vmem:[%s3633_s7 + $0x48] sm:$0xff] }
 0x1aa   : > { %2289 = vmatmul.msk.f32.gmra.mxu0 %vm760_vm1, %v2594_v56  ;;  %2306 = vmatmul.msk.f32.gmra.mxu3 %vm777_vm2, %v2594_v56 }
 0x1ab   : > { %1747 = vmatpush.msrb.mxu0 %v1730_v4 }
 0x1af   : > { %v692_v24 = vpop.permute.xlu1 %691 }
 0x1b0   : > { %v740_v15 = vpop.permute.xlu0 %739  ;;  %vm762_vm7 = vcmp.eq.s32.totalorder %v692_v24, %v3011_v52  ;;  %v925_v3 = vpop.permute.xlu2 %924 }
 0x1b1   : > { %vm778_vm5 = vcmp.eq.s32.totalorder %v740_v15, %v3011_v52  ;;  %2323 = vmatmul.msk.f32.gmra.mxu1 %vm986_vm3, %v2594_v56  ;;  %vm989_vm12 = vcmp.eq.s32.totalorder %v925_v3, %v3011_v52  ;;  %v1728_v3 = vld [vmem:[%s3633_s7 + $0x38] sm:$0xff] }
 0x1b2   : > { %2290 = vmatmul.msk.f32.gmra.mxu0 %vm761_vm4, %v2594_v56  ;;  %2307 = vmatmul.msk.f32.gmra.mxu3 %vm778_vm5, %v2594_v56 }
 0x1b7   : > { %v695_v7 = vpop.permute.xlu1 %694 }
 0x1b8   : > { %v743_v9 = vpop.permute.xlu0 %742  ;;  %vm763_vm10 = vcmp.eq.s32.totalorder %v695_v7, %v3011_v52  ;;  %v934_v32 = vpop.permute.xlu2 %933 }
 0x1b9   : > { %vm779_vm8 = vcmp.eq.s32.totalorder %v743_v9, %v3011_v52  ;;  %2324 = vmatmul.msk.f32.gmra.mxu1 %vm987_vm6, %v2594_v56  ;;  %vm992_vm2 = vcmp.eq.s32.totalorder %v934_v32, %v3011_v52  ;;  %v1724_v32 = vld [vmem:[%s3633_s7 + $0x18] sm:$0xff] }
 0x1ba   : > { %2291 = vmatmul.msk.f32.gmra.mxu0 %vm762_vm7, %v2594_v56  ;;  %2308 = vmatmul.msk.f32.gmra.mxu3 %vm779_vm8, %v2594_v56 }
 0x1bf   : > { %v698_v25 = vpop.permute.xlu1 %697 }
 0x1c0   : > { %v746_v6 = vpop.permute.xlu0 %745  ;;  %vm764_vm13 = vcmp.eq.s32.totalorder %v698_v25, %v3011_v52  ;;  %v943_v44 = vpop.permute.xlu2 %942  ;;  %v1729_v25 = vld [vmem:[%s3633_s7 + $0x40] sm:$0xff] }
 0x1c1   : > { %vm780_vm11 = vcmp.eq.s32.totalorder %v746_v6, %v3011_v52  ;;  %2325 = vmatmul.msk.f32.gmra.mxu1 %vm988_vm9, %v2594_v56  ;;  %vm995_vm5 = vcmp.eq.s32.totalorder %v943_v44, %v3011_v52  ;;  %1748 = vmatpush.msrb.mxu0 %v1729_v25 }
 0x1c2   : > { %2292 = vmatmul.msk.f32.gmra.mxu0 %vm763_vm10, %v2594_v56  ;;  %2309 = vmatmul.msk.f32.gmra.mxu3 %vm780_vm11, %v2594_v56 }
 0x1c3   : > { %1749 = vmatpush.msrb.mxu0 %v1728_v3 }
 0x1c7   : > { %v701_v2 = vpop.permute.xlu1 %700 }
 0x1c8   : > { %v749_v26 = vpop.permute.xlu0 %748  ;;  %vm765_vm15 = vcmp.eq.s32.totalorder %v701_v2, %v3011_v52  ;;  %v952_v59 = vpop.permute.xlu2 %951 }
 0x1c9   : > { %vm781_vm14 = vcmp.eq.s32.totalorder %v749_v26, %v3011_v52  ;;  %2326 = vmatmul.msk.f32.gmra.mxu1 %vm989_vm12, %v2594_v56  ;;  %vm998_vm8 = vcmp.eq.s32.totalorder %v952_v59, %v3011_v52  ;;  %v1727_v26 = vld [vmem:[%s3633_s7 + $0x30] sm:$0xff] }
 0x1ca   : > { %2293 = vmatmul.msk.f32.gmra.mxu0 %vm764_vm13, %v2594_v56  ;;  %2310 = vmatmul.msk.f32.gmra.mxu3 %vm781_vm14, %v2594_v56 }
 0x1cb   : > { %1750 = vmatpush.msrb.mxu0 %v1727_v26 }
 0x1ce   : > { %v1299_v27 = vpop.f32.mrf.mxu1 }
 0x1cf   : > { %1443 = vmatmul.f32.vlgmr.msra.gmra.mxu2 %v1299_v27  ;;  %v931_v0 = vpop.permute.xlu1 %930 }
 0x1d0   : > { %v928_v1 = vpop.permute.xlu0 %927  ;;  %vm991_vm1 = vcmp.eq.s32.totalorder %v931_v0, %v3011_v52  ;;  %v961_v15 = vpop.permute.xlu2 %960  ;;  %v1726_v0 = vld [vmem:[%s3633_s7 + $0x28] sm:$0xff] }
 0x1d1   : > { %vm990_vm0 = vcmp.eq.s32.totalorder %v928_v1, %v3011_v52  ;;  %vm1001_vm11 = vcmp.eq.s32.totalorder %v961_v15, %v3011_v52  ;;  %1751 = vmatpush.msrb.mxu0 %v1726_v0 }
 0x1d2   : > { %2294 = vmatmul.msk.f32.gmra.mxu0 %vm765_vm15, %v2594_v56  ;;  %2327 = vmatmul.msk.f32.gmra.mxu1 %vm990_vm0, %v2594_v56 }
 0x1d5   : > { %v3226_v28 = vpop.f32.mrf.mxu3 }
 0x1d6   : > { %v1302_v29 = vpop.f32.mrf.mxu1 }
 0x1d7   : > { %v1186_v30 = vpop.f32.mrf.mxu0  ;;  %1446 = vmatmul.f32.gmra.mxu2 %v1302_v29  ;;  %v940_v40 = vpop.permute.xlu1 %939 }
 0x1d8   : > { %1556 = vmatmul.f32.vlgmr.msrb.gmra.mxu3 %v1186_v30  ;;  %v937_v36 = vpop.permute.xlu0 %936  ;;  %vm994_vm4 = vcmp.eq.s32.totalorder %v940_v40, %v3011_v52  ;;  %v1725_v30 = vld [vmem:[%s3633_s7 + $0x20] sm:$0xff] }
 0x1d9   : > { %vm993_vm3 = vcmp.eq.s32.totalorder %v937_v36, %v3011_v52  ;;  %1752 = vmatpush.msrb.mxu0 %v1725_v30 }
 0x1da   : > { %2328 = vmatmul.msk.f32.gmra.mxu1 %vm991_vm1, %v2594_v56 }
 0x1db   : > { %1753 = vmatpush.msrb.mxu0 %v1724_v32 }
 0x1dd   : > { %v3230_v31 = vpop.f32.mrf.mxu3 }
 0x1de   : > { %v1305_v33 = vpop.f32.mrf.mxu1 }
 0x1df   : > { %v1189_v34 = vpop.f32.mrf.mxu0  ;;  %1449 = vmatmul.f32.gmra.mxu2 %v1305_v33  ;;  %v949_v54 = vpop.permute.xlu1 %948  ;;  %v1723_v33 = vld [vmem:[%s3633_s7 + $0x10] sm:$0xff] }
 0x1e0   : > { %1559 = vmatmul.f32.gmra.mxu3 %v1189_v34  ;;  %v946_v49 = vpop.permute.xlu0 %945  ;;  %vm997_vm7 = vcmp.eq.s32.totalorder %v949_v54, %v3011_v52  ;;  %1754 = vmatpush.msrb.mxu0 %v1723_v33  ;;  %v970_v34 = vpop.permute.xlu2 %969 }
 0x1e1   : > { %vm996_vm6 = vcmp.eq.s32.totalorder %v946_v49, %v3011_v52  ;;  %vm1004_vm14 = vcmp.eq.s32.totalorder %v970_v34, %v3011_v52 }
 0x1e2   : > { %2329 = vmatmul.msk.f32.gmra.mxu1 %vm992_vm2, %v2594_v56 }
 0x1e5   : > { %v3234_v35 = vpop.f32.mrf.mxu3 }
 0x1e6   : > { %v1308_v37 = vpop.f32.mrf.mxu1 }
 0x1e7   : > { %v1192_v38 = vpop.f32.mrf.mxu0  ;;  %1452 = vmatmul.f32.gmra.mxu2 %v1308_v37  ;;  %v958_v19 = vpop.permute.xlu1 %957  ;;  %v1722_v37 = vld [vmem:[%s3633_s7 + $0x8] sm:$0xff] }
 0x1e8   : > { %1562 = vmatmul.f32.gmra.mxu3 %v1192_v38  ;;  %v955_v63 = vpop.permute.xlu0 %954  ;;  %vm1000_vm10 = vcmp.eq.s32.totalorder %v958_v19, %v3011_v52  ;;  %1755 = vmatpush.msrb.mxu0 %v1722_v37 }
 0x1e9   : > { %vm999_vm9 = vcmp.eq.s32.totalorder %v955_v63, %v3011_v52 }
 0x1ea   : > { %2330 = vmatmul.msk.f32.gmra.mxu1 %vm993_vm3, %v2594_v56 }
 0x1ed   : > { %v3238_v39 = vpop.f32.mrf.mxu3 }
 0x1ee   : > { %v1311_v41 = vpop.f32.mrf.mxu1 }
 0x1ef   : > { %v1195_v42 = vpop.f32.mrf.mxu0  ;;  %1455 = vmatmul.f32.gmra.mxu2 %v1311_v41  ;;  %v967_v27 = vpop.permute.xlu1 %966  ;;  %v1721_v41 = vld [vmem:[%s3633_s7] sm:$0xff] }
 0x1f0   : > { %1565 = vmatmul.f32.gmra.mxu3 %v1195_v42  ;;  %v964_v9 = vpop.permute.xlu0 %963  ;;  %vm1003_vm13 = vcmp.eq.s32.totalorder %v967_v27, %v3011_v52  ;;  %1756 = vmatpush.msrb.mxu0 %v1721_v41 }
 0x1f1   : > { %vm1002_vm12 = vcmp.eq.s32.totalorder %v964_v9, %v3011_v52 }
 0x1f2   : > { %2331 = vmatmul.msk.f32.gmra.mxu1 %vm994_vm4, %v2594_v56 }
 0x1f5   : > { %v3242_v43 = vpop.f32.mrf.mxu3 }
 0x1f6   : > { %v1314_v45 = vpop.f32.mrf.mxu1 }
 0x1f7   : > { %v1198_v46 = vpop.f32.mrf.mxu0  ;;  %1458 = vmatmul.f32.gmra.mxu2 %v1314_v45 }
 0x1f8   : > { %1568 = vmatmul.f32.gmra.mxu3 %v1198_v46  ;;  %v973_v42 = vpop.permute.xlu0 %972 }
 0x1f9   : > { %vm1005_vm15 = vcmp.eq.s32.totalorder %v973_v42, %v3011_v52  ;;  %v3340_v52 = vld [vmem:[%s3632_s6] ss:$0 sm:$0xff] }
 0x1fa   : > { %2332 = vmatmul.msk.f32.gmra.mxu1 %vm995_vm5, %v2594_v56 }
 0x1fd   : > { %v3246_v48 = vpop.f32.mrf.mxu3 }
 0x1fe   : > { %v1317_v50 = vpop.f32.mrf.mxu1 }
 0x1ff   : > { %v1201_v51 = vpop.f32.mrf.mxu0  ;;  %1461 = vmatmul.f32.gmra.mxu2 %v1317_v50 }
 0x200   : > { %1571 = vmatmul.f32.gmra.mxu3 %v1201_v51 }
 0x202   : > { %2333 = vmatmul.msk.f32.gmra.mxu1 %vm996_vm6, %v2594_v56 }
 0x205   : > { %v3250_v53 = vpop.f32.mrf.mxu3 }
 0x206   : > { %v1320_v55 = vpop.f32.mrf.mxu1 }
 0x207   : > { %v1204_v57 = vpop.f32.mrf.mxu0  ;;  %1464 = vmatmul.f32.gmra.mxu2 %v1320_v55 }
 0x208   : > { %1574 = vmatmul.f32.gmra.mxu3 %v1204_v57 }
 0x20a   : > { %2334 = vmatmul.msk.f32.gmra.mxu1 %vm997_vm7, %v2594_v56 }
 0x20d   : > { %v3254_v58 = vpop.f32.mrf.mxu3 }
 0x20e   : > { %v1323_v60 = vpop.f32.mrf.mxu1 }
 0x20f   : > { %v1207_v61 = vpop.f32.mrf.mxu0  ;;  %1467 = vmatmul.f32.gmra.mxu2 %v1323_v60 }
 0x210   : > { %1577 = vmatmul.f32.gmra.mxu3 %v1207_v61 }
 0x212   : > { %2335 = vmatmul.msk.f32.gmra.mxu1 %vm998_vm8, %v2594_v56 }
 0x215   : > { %v3258_v62 = vpop.f32.mrf.mxu3 }
 0x216   : > { %v1326_v12 = vpop.f32.mrf.mxu1 }
 0x217   : > { %v1210_v17 = vpop.f32.mrf.mxu0  ;;  %1470 = vmatmul.f32.gmra.mxu2 %v1326_v12 }
 0x218   : > { %1580 = vmatmul.f32.gmra.mxu3 %v1210_v17 }
 0x21a   : > { %2336 = vmatmul.msk.f32.gmra.mxu1 %vm999_vm9, %v2594_v56 }
 0x21d   : > { %v3262_v18 = vpop.f32.mrf.mxu3 }
 0x21e   : > { %v1329_v20 = vpop.f32.mrf.mxu1 }
 0x21f   : > { %v1213_v21 = vpop.f32.mrf.mxu0  ;;  %1473 = vmatmul.f32.gmra.mxu2 %v1329_v20 }
 0x220   : > { %1583 = vmatmul.f32.gmra.mxu3 %v1213_v21 }
 0x222   : > { %2337 = vmatmul.msk.f32.gmra.mxu1 %vm1000_vm10, %v2594_v56 }
 0x225   : > { %v3272_v24 = vpop.f32.mrf.mxu3 }
 0x226   : > { %v1332_v14 = vpop.f32.mrf.mxu1 }
 0x227   : > { %v1216_v11 = vpop.f32.mrf.mxu0  ;;  %1476 = vmatmul.f32.gmra.mxu2 %v1332_v14 }
 0x228   : > { %1586 = vmatmul.f32.gmra.mxu3 %v1216_v11 }
 0x22a   : > { %2338 = vmatmul.msk.f32.gmra.mxu1 %vm1001_vm11, %v2594_v56 }
 0x22d   : > { %v3288_v7 = vpop.f32.mrf.mxu3 }
 0x22e   : > { %v1335_v5 = vpop.f32.mrf.mxu1 }
 0x22f   : > { %v1219_v6 = vpop.f32.mrf.mxu0  ;;  %1479 = vmatmul.f32.gmra.mxu2 %v1335_v5 }
 0x230   : > { %1589 = vmatmul.f32.gmra.mxu3 %v1219_v6 }
 0x232   : > { %2339 = vmatmul.msk.f32.gmra.mxu1 %vm1002_vm12, %v2594_v56 }
 0x235   : > { %v3304_v2 = vpop.f32.mrf.mxu3 }
 0x236   : > { %v1338_v1 = vpop.f32.mrf.mxu1 }
 0x237   : > { %v1222_v29 = vpop.f32.mrf.mxu0  ;;  %1482 = vmatmul.f32.gmra.mxu2 %v1338_v1 }
 0x238   : > { %1592 = vmatmul.f32.gmra.mxu3 %v1222_v29 }
 0x23a   : > { %2340 = vmatmul.msk.f32.gmra.mxu1 %vm1003_vm13, %v2594_v56 }
 0x23d   : > { %v3323_v38 = vpop.f32.mrf.mxu3 }
 0x23e   : > { %v1341_v36 = vpop.f32.mrf.mxu1 }
 0x23f   : > { %v1225_v40 = vpop.f32.mrf.mxu0  ;;  %1485 = vmatmul.f32.gmra.mxu2 %v1341_v36 }
 0x240   : > { %1595 = vmatmul.f32.gmra.mxu3 %v1225_v40 }
 0x242   : > { %2341 = vmatmul.msk.f32.gmra.mxu1 %vm1004_vm14, %v2594_v56 }
 0x245   : > { %v3331_v46 = vpop.f32.mrf.mxu3 }
 0x246   : > { %v1344_v44 = vpop.f32.mrf.mxu1 }
 0x247   : > { %v1228_v45 = vpop.f32.mrf.mxu0  ;;  %1488 = vmatmul.f32.gmra.mxu2 %v1344_v44 }
 0x248   : > { %1598 = vmatmul.f32.gmra.mxu3 %v1228_v45 }
 0x24a   : > { %2342 = vmatmul.msk.f32.gmra.mxu1 %vm1005_vm15, %v2594_v56 }
 0x24d   : > { %v3334_v54 = vpop.f32.mrf.mxu3 }
 0x24f   : > { %v1231_v49 = vpop.f32.mrf.mxu0  ;;  %v1347_v50 = vpop.f32.mrf.mxu1 }
 0x250   : > { %1491 = vmatmul.f32.gmra.mxu2 %v1347_v50  ;;  %1601 = vmatmul.f32.gmra.mxu3 %v1231_v49 }
 0x252   : > { %v1444_v51 = vpop.f32.mrf.mxu2 }
 0x257   : > { %v1350_v55 = vpop.f32.mrf.mxu1 }
 0x258   : > { %1494 = vmatmul.f32.gmra.mxu2 %v1350_v55  ;;  %1604 = vmatmul.f32.gmra.mxu3 %v3226_v28 }
 0x25a   : > { %v1447_v57 = vpop.f32.mrf.mxu2 }
 0x25b   : > { %v1557_v59 = vpop.f32.mrf.mxu3 }
 0x25c   : > { %v1558_v60 = vadd.f32 %v1557_v59, %v1444_v51 }
 0x25e   : > { %v1657_v61 = vadd.f32 %v3340_v52, %v1558_v60 }
 0x25f   : > { %v1353_v63 = vpop.f32.mrf.mxu1 }
 0x260   : > { %1497 = vmatmul.f32.gmra.mxu2 %v1353_v63  ;;  %1607 = vmatmul.f32.gmra.mxu3 %v3230_v31  ;;  %v1689_v12 = vmax.f32 %v1657_v61, 0.0 }
 0x262   : > { %1757 = vmatmul.f32.vlgmr.msrb.gmra.mxu0 %v1689_v12  ;;  %v1450_v17 = vpop.f32.mrf.mxu2 }
 0x263   : > { %v1560_v19 = vpop.f32.mrf.mxu3 }
 0x264   : > { %v1561_v20 = vadd.f32 %v1560_v19, %v1447_v57 }
 0x266   : > { %v1658_v28 = vadd.f32 %v3340_v52, %v1561_v20 }
 0x267   : > { %v1356_v21 = vpop.f32.mrf.mxu1 }
 0x268   : > { %1500 = vmatmul.f32.gmra.mxu2 %v1356_v21  ;;  %1610 = vmatmul.f32.gmra.mxu3 %v3234_v35  ;;  %v1690_v22 = vmax.f32 %v1658_v28, 0.0 }
 0x26a   : > { %1760 = vmatmul.f32.gmra.mxu0 %v1690_v22  ;;  %v1453_v23 = vpop.f32.mrf.mxu2 }
 0x26b   : > { %v1563_v15 = vpop.f32.mrf.mxu3 }
 0x26c   : > { %v1564_v14 = vadd.f32 %v1563_v15, %v1450_v17 }
 0x26e   : > { %v1659_v16 = vadd.f32 %v3340_v52, %v1564_v14 }
 0x26f   : > { %v1359_v11 = vpop.f32.mrf.mxu1 }
 0x270   : > { %1503 = vmatmul.f32.gmra.mxu2 %v1359_v11  ;;  %1613 = vmatmul.f32.gmra.mxu3 %v3238_v39  ;;  %v1691_v31 = vmax.f32 %v1659_v16, 0.0 }
 0x272   : > { %1763 = vmatmul.f32.gmra.mxu0 %v1691_v31  ;;  %v1456_v10 = vpop.f32.mrf.mxu2 }
 0x273   : > { %v1566_v13 = vpop.f32.mrf.mxu3 }
 0x274   : > { %v1567_v8 = vadd.f32 %v1566_v13, %v1453_v23 }
 0x276   : > { %v1660_v9 = vadd.f32 %v3340_v52, %v1567_v8 }
 0x277   : > { %v1362_v5 = vpop.f32.mrf.mxu1 }
 0x278   : > { %1506 = vmatmul.f32.gmra.mxu2 %v1362_v5  ;;  %1616 = vmatmul.f32.gmra.mxu3 %v3242_v43  ;;  %v1692_v35 = vmax.f32 %v1660_v9, 0.0 }
 0x27a   : > { %1766 = vmatmul.f32.gmra.mxu0 %v1692_v35  ;;  %v1459_v4 = vpop.f32.mrf.mxu2 }
 0x27b   : > { %v1569_v6 = vpop.f32.mrf.mxu3 }
 0x27c   : > { %v1570_v25 = vadd.f32 %v1569_v6, %v1456_v10 }
 0x27e   : > { %v1661_v3 = vadd.f32 %v3340_v52, %v1570_v25 }
 0x27f   : > { %v1365_v26 = vpop.f32.mrf.mxu1 }
 0x280   : > { %1509 = vmatmul.f32.gmra.mxu2 %v1365_v26  ;;  %1619 = vmatmul.f32.gmra.mxu3 %v3246_v48  ;;  %v1693_v39 = vmax.f32 %v1661_v3, 0.0 }
 0x282   : > { %1769 = vmatmul.f32.gmra.mxu0 %v1693_v39  ;;  %v1462_v27 = vpop.f32.mrf.mxu2 }
 0x283   : > { %v1572_v1 = vpop.f32.mrf.mxu3 }
 0x284   : > { %v1573_v0 = vadd.f32 %v1572_v1, %v1459_v4 }
 0x286   : > { %v1662_v29 = vadd.f32 %v3340_v52, %v1573_v0 }
 0x287   : > { %v1368_v30 = vpop.f32.mrf.mxu1 }
 0x288   : > { %1512 = vmatmul.f32.gmra.mxu2 %v1368_v30  ;;  %1622 = vmatmul.f32.gmra.mxu3 %v3250_v53  ;;  %v1694_v43 = vmax.f32 %v1662_v29, 0.0 }
 0x28a   : > { %1772 = vmatmul.f32.gmra.mxu0 %v1694_v43  ;;  %v1465_v32 = vpop.f32.mrf.mxu2 }
 0x28b   : > { %v1575_v33 = vpop.f32.mrf.mxu3 }
 0x28c   : > { %v1576_v34 = vadd.f32 %v1575_v33, %v1462_v27 }
 0x28e   : > { %v1663_v36 = vadd.f32 %v3340_v52, %v1576_v34 }
 0x28f   : > { %v1371_v37 = vpop.f32.mrf.mxu1 }
 0x290   : > { %1515 = vmatmul.f32.gmra.mxu2 %v1371_v37  ;;  %1625 = vmatmul.f32.gmra.mxu3 %v3254_v58  ;;  %v1695_v48 = vmax.f32 %v1663_v36, 0.0 }
 0x292   : > { %1775 = vmatmul.f32.gmra.mxu0 %v1695_v48  ;;  %v1468_v40 = vpop.f32.mrf.mxu2 }
 0x293   : > { %v1578_v41 = vpop.f32.mrf.mxu3 }
 0x294   : > { %v1579_v42 = vadd.f32 %v1578_v41, %v1465_v32 }
 0x296   : > { %v1664_v44 = vadd.f32 %v3340_v52, %v1579_v42 }
 0x297   : > { %v1374_v45 = vpop.f32.mrf.mxu1 }
 0x298   : > { %1518 = vmatmul.f32.gmra.mxu2 %v1374_v45  ;;  %1628 = vmatmul.f32.gmra.mxu3 %v3258_v62  ;;  %v1696_v53 = vmax.f32 %v1664_v44, 0.0 }
 0x29a   : > { %1778 = vmatmul.f32.gmra.mxu0 %v1696_v53  ;;  %v1471_v49 = vpop.f32.mrf.mxu2 }
 0x29b   : > { %v1581_v50 = vpop.f32.mrf.mxu3 }
 0x29c   : > { %v1582_v51 = vadd.f32 %v1581_v50, %v1468_v40 }
 0x29e   : > { %v1665_v55 = vadd.f32 %v3340_v52, %v1582_v51 }
 0x29f   : > { %v1377_v57 = vpop.f32.mrf.mxu1 }
 0x2a0   : > { %v1697_v58 = vmax.f32 %v1665_v55, 0.0  ;;  %1521 = vmatmul.f32.gmra.mxu2 %v1377_v57  ;;  %1631 = vmatmul.f32.gmra.mxu3 %v3262_v18 }
 0x2a2   : > { %1781 = vmatmul.f32.gmra.mxu0 %v1697_v58  ;;  %v1474_v59 = vpop.f32.mrf.mxu2 }
 0x2a3   : > { %v1584_v60 = vpop.f32.mrf.mxu3 }
 0x2a4   : > { %v1585_v61 = vadd.f32 %v1584_v60, %v1471_v49 }
 0x2a6   : > { %v1666_v63 = vadd.f32 %v3340_v52, %v1585_v61 }
 0x2a7   : > { %v1380_v12 = vpop.f32.mrf.mxu1 }
 0x2a8   : > { %v1698_v62 = vmax.f32 %v1666_v63, 0.0  ;;  %1524 = vmatmul.f32.gmra.mxu2 %v1380_v12  ;;  %1634 = vmatmul.f32.gmra.mxu3 %v3272_v24 }
 0x2aa   : > { %1784 = vmatmul.f32.gmra.mxu0 %v1698_v62  ;;  %v1477_v17 = vpop.f32.mrf.mxu2 }
 0x2ab   : > { %v1587_v19 = vpop.f32.mrf.mxu3 }
 0x2ac   : > { %v1588_v20 = vadd.f32 %v1587_v19, %v1474_v59 }
 0x2ae   : > { %v1667_v28 = vadd.f32 %v3340_v52, %v1588_v20 }
 0x2af   : > { %v1383_v21 = vpop.f32.mrf.mxu1 }
 0x2b0   : > { %v1699_v22 = vmax.f32 %v1667_v28, 0.0  ;;  %1527 = vmatmul.f32.gmra.mxu2 %v1383_v21  ;;  %1637 = vmatmul.f32.gmra.mxu3 %v3288_v7 }
 0x2b2   : > { %1787 = vmatmul.f32.gmra.mxu0 %v1699_v22  ;;  %v1480_v18 = vpop.f32.mrf.mxu2 }
 0x2b3   : > { %v1590_v23 = vpop.f32.mrf.mxu3 }
 0x2b4   : > { %v1591_v15 = vadd.f32 %v1590_v23, %v1477_v17 }
 0x2b6   : > { %v1668_v14 = vadd.f32 %v3340_v52, %v1591_v15 }
 0x2b7   : > { %v1386_v16 = vpop.f32.mrf.mxu1 }
 0x2b8   : > { %v1700_v11 = vmax.f32 %v1668_v14, 0.0  ;;  %1530 = vmatmul.f32.gmra.mxu2 %v1386_v16  ;;  %1640 = vmatmul.f32.gmra.mxu3 %v3304_v2 }
 0x2ba   : > { %1790 = vmatmul.f32.gmra.mxu0 %v1700_v11  ;;  %v1483_v24 = vpop.f32.mrf.mxu2 }
 0x2bb   : > { %v1593_v31 = vpop.f32.mrf.mxu3 }
 0x2bc   : > { %v1594_v10 = vadd.f32 %v1593_v31, %v1480_v18 }
 0x2be   : > { %v1669_v13 = vadd.f32 %v3340_v52, %v1594_v10 }
 0x2bf   : > { %v1389_v8 = vpop.f32.mrf.mxu1 }
 0x2c0   : > { %v1701_v9 = vmax.f32 %v1669_v13, 0.0  ;;  %1533 = vmatmul.f32.gmra.mxu2 %v1389_v8  ;;  %1643 = vmatmul.f32.gmra.mxu3 %v3323_v38 }
 0x2c2   : > { %1793 = vmatmul.f32.gmra.mxu0 %v1701_v9  ;;  %v1486_v7 = vpop.f32.mrf.mxu2 }
 0x2c3   : > { %v1596_v5 = vpop.f32.mrf.mxu3 }
 0x2c4   : > { %v1597_v35 = vadd.f32 %v1596_v5, %v1483_v24 }
 0x2c6   : > { %v1670_v4 = vadd.f32 %v3340_v52, %v1597_v35 }
 0x2c7   : > { %v1392_v6 = vpop.f32.mrf.mxu1 }
 0x2c8   : > { %v1702_v25 = vmax.f32 %v1670_v4, 0.0  ;;  %1536 = vmatmul.f32.gmra.mxu2 %v1392_v6  ;;  %1646 = vmatmul.f32.gmra.mxu3 %v3331_v46 }
 0x2ca   : > { %1796 = vmatmul.f32.gmra.mxu0 %v1702_v25  ;;  %v1489_v2 = vpop.f32.mrf.mxu2 }
 0x2cb   : > { %v1599_v3 = vpop.f32.mrf.mxu3 }
 0x2cc   : > { %v1600_v26 = vadd.f32 %v1599_v3, %v1486_v7 }
 0x2ce   : > { %v1671_v39 = vadd.f32 %v3340_v52, %v1600_v26 }
 0x2d0   : > { %v1703_v27 = vmax.f32 %v1671_v39, 0.0  ;;  %1649 = vmatmul.f32.gmra.mxu3 %v3334_v54 }
 0x2d2   : > { %1799 = vmatmul.f32.gmra.mxu0 %v1703_v27 }
 0x2d3   : > { %v1492_v38 = vpop.f32.mrf.mxu2  ;;  %v1602_v1 = vpop.f32.mrf.mxu3 }
 0x2d4   : > { %v1603_v0 = vadd.f32 %v1602_v1, %v1489_v2 }
 0x2d6   : > { %v1672_v29 = vadd.f32 %v3340_v52, %v1603_v0 }
 0x2d8   : > { %v1704_v30 = vmax.f32 %v1672_v29, 0.0 }
 0x2da   : > { %1802 = vmatmul.f32.gmra.mxu0 %v1704_v30 }
 0x2db   : > { %v1495_v43 = vpop.f32.mrf.mxu2  ;;  %v1605_v32 = vpop.f32.mrf.mxu3 }
 0x2dc   : > { %v1606_v46 = vadd.f32 %v1605_v32, %v1492_v38 }
 0x2de   : > { %v1673_v33 = vadd.f32 %v3340_v52, %v1606_v46 }
 0x2df   : > { %v3374_v34 = vpop.f32.mrf.mxu0 }
 0x2e0   : > { %v1705_v36 = vmax.f32 %v1673_v33, 0.0 }
 0x2e2   : > { %1805 = vmatmul.f32.gmra.mxu0 %v1705_v36 }
 0x2e3   : > { %v1498_v37 = vpop.f32.mrf.mxu2  ;;  %v1608_v48 = vpop.f32.mrf.mxu3 }
 0x2e4   : > { %v1609_v54 = vadd.f32 %v1608_v48, %v1495_v43 }
 0x2e6   : > { %v1674_v40 = vadd.f32 %v3340_v52, %v1609_v54 }
 0x2e7   : > { %v3377_v41 = vpop.f32.mrf.mxu0 }
 0x2e8   : > { %v1706_v42 = vmax.f32 %v1674_v40, 0.0 }
 0x2ea   : > { %1808 = vmatmul.f32.gmra.mxu0 %v1706_v42 }
 0x2eb   : > { %v1501_v44 = vpop.f32.mrf.mxu2  ;;  %v1611_v45 = vpop.f32.mrf.mxu3 }
 0x2ec   : > { %v1612_v53 = vadd.f32 %v1611_v45, %v1498_v37 }
 0x2ee   : > { %v1675_v49 = vadd.f32 %v3340_v52, %v1612_v53 }
 0x2ef   : > { %v3380_v50 = vpop.f32.mrf.mxu0 }
 0x2f0   : > { %v1707_v51 = vmax.f32 %v1675_v49, 0.0 }
 0x2f2   : > { %1811 = vmatmul.f32.gmra.mxu0 %v1707_v51 }
 0x2f3   : > { %v1504_v55 = vpop.f32.mrf.mxu2  ;;  %v1614_v57 = vpop.f32.mrf.mxu3 }
 0x2f4   : > { %v1615_v58 = vadd.f32 %v1614_v57, %v1501_v44 }
 0x2f6   : > { %v1676_v59 = vadd.f32 %v3340_v52, %v1615_v58 }
 0x2f7   : > { %v3383_v60 = vpop.f32.mrf.mxu0 }
 0x2f8   : > { %v1708_v61 = vmax.f32 %v1676_v59, 0.0 }
 0x2fa   : > { %1814 = vmatmul.f32.gmra.mxu0 %v1708_v61 }
 0x2fb   : > { %v1507_v63 = vpop.f32.mrf.mxu2  ;;  %v1617_v12 = vpop.f32.mrf.mxu3 }
 0x2fc   : > { %v1618_v62 = vadd.f32 %v1617_v12, %v1504_v55 }
 0x2fe   : > { %v1677_v17 = vadd.f32 %v3340_v52, %v1618_v62 }
 0x2ff   : > { %v3386_v19 = vpop.f32.mrf.mxu0 }
 0x300   : > { %v1709_v20 = vmax.f32 %v1677_v17, 0.0 }
 0x302   : > { %1817 = vmatmul.f32.gmra.mxu0 %v1709_v20 }
 0x303   : > { %v1510_v28 = vpop.f32.mrf.mxu2  ;;  %v1620_v21 = vpop.f32.mrf.mxu3 }
 0x304   : > { %v1621_v22 = vadd.f32 %v1620_v21, %v1507_v63 }
 0x306   : > { %v1678_v18 = vadd.f32 %v3340_v52, %v1621_v22 }
 0x307   : > { %v3389_v23 = vpop.f32.mrf.mxu0 }
 0x308   : > { %v1710_v15 = vmax.f32 %v1678_v18, 0.0 }
 0x30a   : > { %1820 = vmatmul.f32.gmra.mxu0 %v1710_v15 }
 0x30b   : > { %v1513_v14 = vpop.f32.mrf.mxu2  ;;  %v1623_v16 = vpop.f32.mrf.mxu3 }
 0x30c   : > { %v1624_v11 = vadd.f32 %v1623_v16, %v1510_v28  ;;  %v3409_v16 = vld [vmem:[%s3634_s8] ss:$0 sm:$0xff] }
 0x30e   : > { %v1679_v24 = vadd.f32 %v3340_v52, %v1624_v11 }
 0x30f   : > { %v3392_v31 = vpop.f32.mrf.mxu0 }
 0x310   : > { %v1711_v10 = vmax.f32 %v1679_v24, 0.0 }
 0x312   : > { %1823 = vmatmul.f32.gmra.mxu0 %v1711_v10 }
 0x313   : > { %v1516_v13 = vpop.f32.mrf.mxu2  ;;  %v1626_v8 = vpop.f32.mrf.mxu3 }
 0x314   : > { %v1627_v9 = vadd.f32 %v1626_v8, %v1513_v14 }
 0x316   : > { %v1680_v7 = vadd.f32 %v3340_v52, %v1627_v9 }
 0x317   : > { %v3395_v5 = vpop.f32.mrf.mxu0 }
 0x318   : > { %v1712_v35 = vmax.f32 %v1680_v7, 0.0 }
 0x31a   : > { %1826 = vmatmul.f32.gmra.mxu0 %v1712_v35 }
 0x31b   : > { %v1519_v4 = vpop.f32.mrf.mxu2  ;;  %v1629_v6 = vpop.f32.mrf.mxu3 }
 0x31c   : > { %v1630_v25 = vadd.f32 %v1629_v6, %v1516_v13 }
 0x31e   : > { %v1681_v2 = vadd.f32 %v3340_v52, %v1630_v25 }
 0x31f   : > { %v3398_v3 = vpop.f32.mrf.mxu0 }
 0x320   : > { %v1713_v26 = vmax.f32 %v1681_v2, 0.0 }
 0x322   : > { %1829 = vmatmul.f32.gmra.mxu0 %v1713_v26 }
 0x323   : > { %v1522_v39 = vpop.f32.mrf.mxu2  ;;  %v1632_v27 = vpop.f32.mrf.mxu3 }
 0x324   : > { %v1633_v38 = vadd.f32 %v1632_v27, %v1519_v4 }
 0x326   : > { %v1682_v1 = vadd.f32 %v3340_v52, %v1633_v38  ;;  %v1783_v38 = vadd.f32 %v3409_v16, %v3398_v3  ;;  %v1771_v3 = vadd.f32 %v3409_v16, %v3386_v19  ;;  %v1759_v19 = vadd.f32 %v3409_v16, %v3374_v34 }
 0x327   : > { %v1785_v0 = vpop.f32.mrf.mxu0 }
 0x328   : > { %v1714_v29 = vmax.f32 %v1682_v1, 0.0 }
 0x32a   : > { %1832 = vmatmul.f32.gmra.mxu0 %v1714_v29  ;;  %v1780_v29 = vadd.f32 %v3409_v16, %v3395_v5  ;;  %v1768_v5 = vadd.f32 %v3409_v16, %v3383_v60 }
 0x32b   : > { %v1525_v30 = vpop.f32.mrf.mxu2  ;;  %v1635_v43 = vpop.f32.mrf.mxu3 }
 0x32c   : > { %v1636_v32 = vadd.f32 %v1635_v43, %v1522_v39  ;;  %v1786_v39 = vadd.f32 %v3409_v16, %v1785_v0  ;;  %v1774_v0 = vadd.f32 %v3409_v16, %v3389_v23  ;;  %v1762_v23 = vadd.f32 %v3409_v16, %v3377_v41 }
 0x32e   : > { %v1683_v46 = vadd.f32 %v3340_v52, %v1636_v32  ;;  %v1777_v32 = vadd.f32 %v3409_v16, %v3392_v31  ;;  %v1765_v31 = vadd.f32 %v3409_v16, %v3380_v50  ;;  %v1855_v60 = vmax.f32 %v1762_v23, 0.0 }
 0x32f   : > { %v1788_v33 = vpop.f32.mrf.mxu0 }
 0x330   : > { %v1715_v36 = vmax.f32 %v1683_v46, 0.0  ;;  %v1862_v46 = vmax.f32 %v1783_v38, 0.0 }
 0x332   : > { %1835 = vmatmul.f32.gmra.mxu0 %v1715_v36  ;;  %v1860_v36 = vmax.f32 %v1777_v32, 0.0 }
 0x333   : > { %v1638_v37 = vpop.f32.mrf.mxu3  ;;  %v1528_v54 = vpop.f32.mrf.mxu2 }
 0x334   : > { %v1639_v48 = vadd.f32 %v1638_v37, %v1525_v30  ;;  %v1863_v30 = vmax.f32 %v1786_v39, 0.0  ;;  %v1859_v37 = vmax.f32 %v1774_v0, 0.0 }
 0x336   : > { %v1684_v40 = vadd.f32 %v3340_v52, %v1639_v48 }
 0x337   : > { %v1791_v42 = vpop.f32.mrf.mxu0 }
 0x338   : > { %v1716_v44 = vmax.f32 %v1684_v40, 0.0  ;;  %v1792_v6 = vadd.f32 %v3409_v16, %v1791_v42  ;;  %v1857_v40 = vmax.f32 %v1768_v5, 0.0  ;;  %v1856_v42 = vmax.f32 %v1765_v31, 0.0 }
 0x33a   : > { %1838 = vmatmul.f32.gmra.mxu0 %v1716_v44  ;;  %v1865_v27 = vmax.f32 %v1792_v6, 0.0 }
 0x33b   : > { %v1641_v45 = vpop.f32.mrf.mxu3  ;;  %v1531_v51 = vpop.f32.mrf.mxu2 }
 0x33c   : > { %v1642_v53 = vadd.f32 %v1641_v45, %v1528_v54  ;;  %v1858_v54 = vmax.f32 %v1771_v3, 0.0  ;;  %v1854_v45 = vmax.f32 %v1759_v19, 0.0 }
 0x33e   : > { %v1685_v49 = vadd.f32 %v3340_v52, %v1642_v53 }
 0x33f   : > { %v1794_v55 = vpop.f32.mrf.mxu0 }
 0x340   : > { %v1717_v57 = vmax.f32 %v1685_v49, 0.0  ;;  %v1795_v35 = vadd.f32 %v3409_v16, %v1794_v55 }
 0x342   : > { %1841 = vmatmul.f32.gmra.mxu0 %v1717_v57  ;;  %v1866_v26 = vmax.f32 %v1795_v35, 0.0 }
 0x343   : > { %v1644_v58 = vpop.f32.mrf.mxu3  ;;  %v1534_v62 = vpop.f32.mrf.mxu2 }
 0x344   : > { %v1645_v59 = vadd.f32 %v1644_v58, %v1531_v51 }
 0x346   : > { %v1686_v61 = vadd.f32 %v3340_v52, %v1645_v59 }
 0x347   : > { %v1797_v63 = vpop.f32.mrf.mxu0 }
 0x348   : > { %v1718_v12 = vmax.f32 %v1686_v61, 0.0  ;;  %v1798_v9 = vadd.f32 %v3409_v16, %v1797_v63 }
 0x34a   : > { %1844 = vmatmul.f32.gmra.mxu0 %v1718_v12  ;;  %v1867_v25 = vmax.f32 %v1798_v9, 0.0 }
 0x34b   : > { %v1647_v17 = vpop.f32.mrf.mxu3  ;;  %v1537_v18 = vpop.f32.mrf.mxu2 }
 0x34c   : > { %v1648_v20 = vadd.f32 %v1647_v17, %v1534_v62 }
 0x34e   : > { %v1687_v28 = vadd.f32 %v3340_v52, %v1648_v20 }
 0x34f   : > { %v1800_v21 = vpop.f32.mrf.mxu0 }
 0x350   : > { %v1719_v22 = vmax.f32 %v1687_v28, 0.0  ;;  %v1801_v10 = vadd.f32 %v3409_v16, %v1800_v21  ;;  %v1070_v28 = vld [vmem:[%s3646_s15] sm:$0x3]  ;;  %v3452_v21 = vshrl.u32 %v603_v47, 7 }
 0x351   : > { %v3483_v5 = vperm.slane %v1070_v28, 1 }
 0x352   : > { %1847 = vmatmul.f32.gmra.mxu0 %v1719_v22  ;;  %v1868_v4 = vmax.f32 %v1801_v10, 0.0  ;;  %v3454_v22 = vperm.slane %v1070_v28, 0  ;;  %v607_v47 = vadd.s32 8, %v3452_v21  ;;  %v613_v31 = vadd.s32 56, %v3452_v21 }
 0x353   : > { %v1650_v15 = vpop.f32.mrf.mxu3  ;;  %vm1074_vm4 = vcmp.eq.s32.totalorder %v3452_v21, %v3483_v5  ;;  %v615_v23 = vadd.s32 72, %v3452_v21  ;;  %v617_v19 = vadd.s32 88, %v3452_v21 }
 0x354   : > { %v1651_v14 = vadd.f32 %v1650_v15, %v1537_v18  ;;  %vm1073_vm0 = vcmp.eq.s32.totalorder %v3452_v21, %v3454_v22  ;;  %vm1075_vm1 = vcmp.eq.s32.totalorder %v607_v47, %v3454_v22  ;;  %vm1076_vm6 = vcmp.eq.s32.totalorder %v607_v47, %v3483_v5 }
 0x355   : > { %vm1087_vm11 = vcmp.eq.s32.totalorder %v613_v31, %v3454_v22  ;;  %vm1091_vm15 = vcmp.eq.s32.totalorder %v615_v23, %v3454_v22 }
 0x356   : > { %v1688_v11 = vadd.f32 %v3340_v52, %v1651_v14  ;;  %v1789_v52 = vadd.f32 %v3409_v16, %v1788_v33  ;;  %v1861_v33 = vmax.f32 %v1780_v29, 0.0 }
 0x357   : > { %v1803_v24 = vpop.f32.mrf.mxu0 }
 0x358   : > { %v1720_v13 = vmax.f32 %v1688_v11, 0.0  ;;  %v1804_v8 = vadd.f32 %v3409_v16, %v1803_v24  ;;  %v1864_v1 = vmax.f32 %v1789_v52, 0.0  ;;  %v608_v52 = vadd.s32 16, %v3452_v21 }
 0x35a   : > { %v1869_v7 = vmax.f32 %v1804_v8, 0.0  ;;  %1850 = vmatmul.f32.gmra.mxu0 %v1720_v13  ;;  %vm1077_vm2 = vcmp.eq.s32.totalorder %v608_v52, %v3454_v22  ;;  %vm1078_vm8 = vcmp.eq.s32.totalorder %v608_v52, %v3483_v5 }
 0x35c   : > { %1902 = vmatpush.msrb.mxu1 %v1869_v7 }
 0x35e   : > { %1903 = vmatpush.msrb.mxu1 %v1868_v4 }
 0x35f   : > { %v3417_v2 = vpop.f32.mrf.mxu0 }
 0x360   : > { %1904 = vmatpush.msrb.mxu1 %v1867_v25  ;;  %v1807_v3 = vadd.f32 %v3409_v16, %v3417_v2  ;;  %v612_v2 = vadd.s32 48, %v3452_v21 }
 0x362   : > { %1905 = vmatpush.msrb.mxu1 %v1866_v26  ;;  %vm1085_vm9 = vcmp.eq.s32.totalorder %v612_v2, %v3454_v22 }
 0x364   : > { %1906 = vmatpush.msrb.mxu1 %v1865_v27 }
 0x366   : > { %1907 = vmatpush.msrb.mxu1 %v1864_v1 }
 0x367   : > { %v3425_v43 = vpop.f32.mrf.mxu0 }
 0x368   : > { %1908 = vmatpush.msrb.mxu1 %v1863_v30  ;;  %v1810_v0 = vadd.f32 %v3409_v16, %v3425_v43  ;;  %v610_v43 = vadd.s32 32, %v3452_v21 }
 0x36a   : > { %1909 = vmatpush.msrb.mxu1 %v1862_v46  ;;  %v609_v46 = vadd.s32 24, %v3452_v21  ;;  %vm1081_vm5 = vcmp.eq.s32.totalorder %v610_v43, %v3454_v22  ;;  %vm1082_vm12 = vcmp.eq.s32.totalorder %v610_v43, %v3483_v5  ;;  %v1896_v43 = vld [vmem:[%s2777_s25 + $0x50] sm:$0xff] }
 0x36c   : > { %1910 = vmatpush.msrb.mxu1 %v1861_v33  ;;  %vm1079_vm3 = vcmp.eq.s32.totalorder %v609_v46, %v3454_v22  ;;  %vm1080_vm10 = vcmp.eq.s32.totalorder %v609_v46, %v3483_v5 }
 0x36e   : > { %1911 = vmatpush.msrb.mxu1 %v1860_v36 }
 0x36f   : > { %v3435_v48 = vpop.f32.mrf.mxu0 }
 0x370   : > { %1912 = vmatpush.msrb.mxu1 %v1859_v37  ;;  %v1813_v30 = vadd.f32 %v3409_v16, %v3435_v48  ;;  %v1871_v37 = vmax.f32 %v1810_v0, 0.0  ;;  %v1870_v48 = vmax.f32 %v1807_v3, 0.0  ;;  %v1895_v3 = vld [vmem:[%s2777_s25 + $0x48] sm:$0xff] }
 0x372   : > { %1913 = vmatpush.msrb.mxu1 %v1858_v54  ;;  %v1872_v36 = vmax.f32 %v1813_v30, 0.0  ;;  %v614_v54 = vadd.s32 64, %v3452_v21  ;;  %v1894_v30 = vld [vmem:[%s2777_s25 + $0x40] sm:$0xff] }
 0x374   : > { %1914 = vmatpush.msrb.mxu1 %v1857_v40  ;;  %vm1089_vm13 = vcmp.eq.s32.totalorder %v614_v54, %v3454_v22  ;;  %v616_v40 = vadd.s32 80, %v3452_v21 }
 0x376   : > { %1915 = vmatpush.msrb.mxu1 %v1856_v42  ;;  %v618_v42 = vadd.s32 96, %v3452_v21 }
 0x377   : > { %v1815_v44 = vpop.f32.mrf.mxu0 }
 0x378   : > { %1916 = vmatpush.msrb.mxu1 %v1855_v60  ;;  %v1816_v1 = vadd.f32 %v3409_v16, %v1815_v44  ;;  %v619_v60 = vadd.s32 104, %v3452_v21  ;;  %v620_v44 = vadd.s32 112, %v3452_v21 }
 0x37a   : > { %1917 = vmatpush.msrb.mxu1 %v1854_v45  ;;  %v1873_v33 = vmax.f32 %v1816_v1, 0.0  ;;  %v621_v45 = vadd.s32 120, %v3452_v21 }
 0x37b   : > { %2343 = vmatmul.msk.f32.vlgmr.msrb.gmra.mxu1 %vm1073_vm0, %v2594_v56  ;;  %vm1086_vm0 = vcmp.eq.s32.totalorder %v612_v2, %v3483_v5 }
 0x37f   : > { %v1818_v53 = vpop.f32.mrf.mxu0 }
 0x380   : > { %v1819_v27 = vadd.f32 %v3409_v16, %v1818_v53 }
 0x382   : > { %v1874_v32 = vmax.f32 %v1819_v27, 0.0 }
 0x383   : > { %2344 = vmatmul.msk.f32.gmra.mxu1 %vm1075_vm1, %v2594_v56  ;;  %vm1093_vm1 = vcmp.eq.s32.totalorder %v616_v40, %v3454_v22 }
 0x387   : > { %v1821_v50 = vpop.f32.mrf.mxu0 }
 0x388   : > { %v1822_v26 = vadd.f32 %v3409_v16, %v1821_v50 }
 0x38a   : > { %v1875_v29 = vmax.f32 %v1822_v26, 0.0 }
 0x38b   : > { %2345 = vmatmul.msk.f32.gmra.mxu1 %vm1077_vm2, %v2594_v56  ;;  %vm1088_vm2 = vcmp.eq.s32.totalorder %v613_v31, %v3483_v5 }
 0x38f   : > { %v1824_v49 = vpop.f32.mrf.mxu0 }
 0x390   : > { %v1825_v6 = vadd.f32 %v3409_v16, %v1824_v49 }
 0x392   : > { %v1876_v38 = vmax.f32 %v1825_v6, 0.0 }
 0x393   : > { %2346 = vmatmul.msk.f32.gmra.mxu1 %vm1079_vm3, %v2594_v56  ;;  %vm1095_vm3 = vcmp.eq.s32.totalorder %v617_v19, %v3454_v22 }
 0x397   : > { %v1827_v51 = vpop.f32.mrf.mxu0 }
 0x398   : > { %v1828_v35 = vadd.f32 %v3409_v16, %v1827_v51 }
 0x39a   : > { %v1877_v39 = vmax.f32 %v1828_v35, 0.0 }
 0x39b   : > { %2347 = vmatmul.msk.f32.gmra.mxu1 %vm1081_vm5, %v2594_v56  ;;  %vm1097_vm5 = vcmp.eq.s32.totalorder %v618_v42, %v3454_v22 }
 0x39f   : > { %v1830_v55 = vpop.f32.mrf.mxu0 }
 0x3a0   : > { %v1831_v9 = vadd.f32 %v3409_v16, %v1830_v55  ;;  %v1886_v55 = vld [vmem:[%s2777_s25] sm:$0xff] }
 0x3a2   : > { %v1878_v25 = vmax.f32 %v1831_v9, 0.0 }
 0x3a7   : > { %v1833_v41 = vpop.f32.mrf.mxu0 }
 0x3a8   : > { %v1834_v13 = vadd.f32 %v3409_v16, %v1833_v41 }
 0x3aa   : > { %v1879_v4 = vmax.f32 %v1834_v13, 0.0 }
 0x3af   : > { %v1836_v57 = vpop.f32.mrf.mxu0 }
 0x3b0   : > { %v1837_v24 = vadd.f32 %v3409_v16, %v1836_v57 }
 0x3b2   : > { %v1880_v7 = vmax.f32 %v1837_v24, 0.0 }
 0x3b7   : > { %v1839_v58 = vpop.f32.mrf.mxu0 }
 0x3b8   : > { %v1840_v14 = vadd.f32 %v3409_v16, %v1839_v58 }
 0x3ba   : > { %v1881_v8 = vmax.f32 %v1840_v14, 0.0 }
 0x3bf   : > { %v1842_v59 = vpop.f32.mrf.mxu0 }
 0x3c0   : > { %v1843_v18 = vadd.f32 %v3409_v16, %v1842_v59  ;;  %v1887_v59 = vld [vmem:[%s2777_s25 + $0x8] sm:$0xff] }
 0x3c2   : > { %v1882_v10 = vmax.f32 %v1843_v18, 0.0 }
 0x3c7   : > { %v1845_v61 = vpop.f32.mrf.mxu0 }
 0x3c8   : > { %v1846_v17 = vadd.f32 %v3409_v16, %v1845_v61 }
 0x3ca   : > { %v1883_v11 = vmax.f32 %v1846_v17, 0.0 }
 0x3cf   : > { %v1848_v34 = vpop.f32.mrf.mxu0 }
 0x3d0   : > { %v1849_v12 = vadd.f32 %v3409_v16, %v1848_v34 }
 0x3d2   : > { %v1884_v15 = vmax.f32 %v1849_v12, 0.0 }
 0x3d7   : > { %v1851_v63 = vpop.f32.mrf.mxu0 }
 0x3d8   : > { %v1852_v62 = vadd.f32 %v3409_v16, %v1851_v63  ;;  %v611_v16 = vadd.s32 40, %v3452_v21  ;;  %v1889_v21 = vld [vmem:[%s2777_s25 + $0x18] sm:$0xff] }
 0x3da   : > { %v1885_v20 = vmax.f32 %v1852_v62, 0.0  ;;  %vm1083_vm7 = vcmp.eq.s32.totalorder %v611_v16, %v3454_v22  ;;  %vm1084_vm14 = vcmp.eq.s32.totalorder %v611_v16, %v3483_v5  ;;  %v1888_v62 = vld [vmem:[%s2777_s25 + $0x10] sm:$0xff] }
 0x3db   : > { %2348 = vmatmul.msk.f32.gmra.mxu1 %vm1083_vm7, %v2594_v56  ;;  %vm1099_vm7 = vcmp.eq.s32.totalorder %v619_v60, %v3454_v22 }
 0x3dc   : > { %1967 = vmatpush.msrb.mxu2 %v1885_v20 }
 0x3de   : > { %1968 = vmatpush.msrb.mxu2 %v1884_v15 }
 0x3e0   : > { %1969 = vmatpush.msrb.mxu2 %v1883_v11  ;;  %v1890_v11 = vld [vmem:[%s2777_s25 + $0x20] sm:$0xff] }
 0x3e2   : > { %1970 = vmatpush.msrb.mxu2 %v1882_v10 }
 0x3e3   : > { %2349 = vmatmul.msk.f32.gmra.mxu1 %vm1085_vm9, %v2594_v56  ;;  %vm1101_vm9 = vcmp.eq.s32.totalorder %v620_v44, %v3454_v22 }
 0x3e4   : > { %1971 = vmatpush.msrb.mxu2 %v1881_v8  ;;  %v1891_v8 = vld [vmem:[%s2777_s25 + $0x28] sm:$0xff] }
 0x3e6   : > { %1972 = vmatpush.msrb.mxu2 %v1880_v7 }
 0x3e8   : > { %1973 = vmatpush.msrb.mxu2 %v1879_v4  ;;  %v1892_v4 = vld [vmem:[%s2777_s25 + $0x30] sm:$0xff] }
 0x3ea   : > { %1974 = vmatpush.msrb.mxu2 %v1878_v25 }
 0x3eb   : > { %2350 = vmatmul.msk.f32.gmra.mxu1 %vm1087_vm11, %v2594_v56  ;;  %vm1103_vm11 = vcmp.eq.s32.totalorder %v621_v45, %v3454_v22 }
 0x3ec   : > { %1975 = vmatpush.msrb.mxu2 %v1877_v39  ;;  %v1893_v39 = vld [vmem:[%s2777_s25 + $0x38] sm:$0xff] }
 0x3ee   : > { %1976 = vmatpush.msrb.mxu2 %v1876_v38 }
 0x3f0   : > { %1977 = vmatpush.msrb.mxu2 %v1875_v29 }
 0x3f2   : > { %1978 = vmatpush.msrb.mxu2 %v1874_v32 }
 0x3f3   : > { %2351 = vmatmul.msk.f32.gmra.mxu1 %vm1089_vm13, %v2594_v56  ;;  %vm1100_vm13 = vcmp.eq.s32.totalorder %v619_v60, %v3483_v5  ;;  %v1898_v60 = vld [vmem:[%s2777_s25 + $0x60] sm:$0xff] }
 0x3f4   : > { %1979 = vmatpush.msrb.mxu2 %v1873_v33 }
 0x3f6   : > { %1980 = vmatpush.msrb.mxu2 %v1872_v36 }
 0x3f8   : > { %1981 = vmatpush.msrb.mxu2 %v1871_v37  ;;  %v1919_v53 = vpop.f32.mrf.mxu1 }
 0x3fa   : > { %1982 = vmatpush.msrb.mxu2 %v1870_v48 }
 0x3fb   : > { %2359 = vmatmul.msk.f32.vlgmr.msrb.gmra.mxu2 %vm1074_vm4, %v2594_v56  ;;  %2352 = vmatmul.msk.f32.gmra.mxu1 %vm1091_vm15, %v2594_v56  ;;  %vm1090_vm4 = vcmp.eq.s32.totalorder %v614_v54, %v3483_v5  ;;  %vm1104_vm15 = vcmp.eq.s32.totalorder %v621_v45, %v3483_v5  ;;  %v1897_v54 = vld [vmem:[%s2777_s25 + $0x58] sm:$0xff] }
 0x400   : > { %v1922_v50 = vpop.f32.mrf.mxu1 }
 0x403   : > { %2360 = vmatmul.msk.f32.gmra.mxu2 %vm1076_vm6, %v2594_v56  ;;  %2353 = vmatmul.msk.f32.gmra.mxu1 %vm1093_vm1, %v2594_v56  ;;  %vm1092_vm6 = vcmp.eq.s32.totalorder %v615_v23, %v3483_v5 }
 0x408   : > { %v1925_v49 = vpop.f32.mrf.mxu1 }
 0x40b   : > { %2361 = vmatmul.msk.f32.gmra.mxu2 %vm1078_vm8, %v2594_v56  ;;  %2354 = vmatmul.msk.f32.gmra.mxu1 %vm1095_vm3, %v2594_v56  ;;  %vm1094_vm8 = vcmp.eq.s32.totalorder %v616_v40, %v3483_v5 }
 0x410   : > { %v1928_v51 = vpop.f32.mrf.mxu1 }
 0x413   : > { %2362 = vmatmul.msk.f32.gmra.mxu2 %vm1080_vm10, %v2594_v56  ;;  %2355 = vmatmul.msk.f32.gmra.mxu1 %vm1097_vm5, %v2594_v56  ;;  %vm1096_vm10 = vcmp.eq.s32.totalorder %v617_v19, %v3483_v5 }
 0x418   : > { %v1931_v34 = vpop.f32.mrf.mxu1 }
 0x41b   : > { %2363 = vmatmul.msk.f32.gmra.mxu2 %vm1082_vm12, %v2594_v56  ;;  %2356 = vmatmul.msk.f32.gmra.mxu1 %vm1099_vm7, %v2594_v56  ;;  %vm1098_vm12 = vcmp.eq.s32.totalorder %v618_v42, %v3483_v5 }
 0x423   : > { %2364 = vmatmul.msk.f32.gmra.mxu2 %vm1084_vm14, %v2594_v56  ;;  %2357 = vmatmul.msk.f32.gmra.mxu1 %vm1101_vm9, %v2594_v56  ;;  %vm1102_vm14 = vcmp.eq.s32.totalorder %v620_v44, %v3483_v5 }
 0x42b   : > { %2365 = vmatmul.msk.f32.gmra.mxu2 %vm1086_vm0, %v2594_v56  ;;  %2358 = vmatmul.msk.f32.gmra.mxu1 %vm1103_vm11, %v2594_v56 }
 0x433   : > { %2366 = vmatmul.msk.f32.gmra.mxu2 %vm1088_vm2, %v2594_v56 }
 0x43b   : > { %2367 = vmatmul.msk.f32.gmra.mxu2 %vm1090_vm4, %v2594_v56 }
 0x443   : > { %2368 = vmatmul.msk.f32.gmra.mxu2 %vm1092_vm6, %v2594_v56 }
 0x44b   : > { %2369 = vmatmul.msk.f32.gmra.mxu2 %vm1094_vm8, %v2594_v56 }
 0x453   : > { %2370 = vmatmul.msk.f32.gmra.mxu2 %vm1096_vm10, %v2594_v56 }
 0x458   : > { %v1934_v20 = vpop.f32.mrf.mxu1 }
 0x45b   : > { %2371 = vmatmul.msk.f32.gmra.mxu2 %vm1098_vm12, %v2594_v56 }
 0x460   : > { %v1937_v14 = vpop.f32.mrf.mxu1 }
 0x463   : > { %2372 = vmatmul.msk.f32.gmra.mxu2 %vm1100_vm13, %v2594_v56 }
 0x468   : > { %v1940_v13 = vpop.f32.mrf.mxu1 }
 0x46b   : > { %2373 = vmatmul.msk.f32.gmra.mxu2 %vm1102_vm14, %v2594_v56 }
 0x470   : > { %v1943_v25 = vpop.f32.mrf.mxu1 }
 0x473   : > { %2374 = vmatmul.msk.f32.gmra.mxu2 %vm1104_vm15, %v2594_v56 }
 0x478   : > { %v1946_v1 = vpop.f32.mrf.mxu1 }
 0x47e   : > { %v1984_v41 = vpop.f32.mrf.mxu2 }
 0x47f   : > { %v1985_v57 = vadd.f32 %v1984_v41, %v1919_v53 }
 0x480   : > { %v1949_v33 = vpop.f32.mrf.mxu1 }
 0x481   : > { %v2032_v58 = vadd.f32 %v1985_v57, %v1886_v55 }
 0x483   : > { %2048 = vst [vmem:[%s2777_s25] sm:$0xff] %v2032_v58  ;;  %v1900_v58 = vld [vmem:[%s2777_s25 + $0x70] sm:$0xff] }
 0x486   : > { %v1987_v61 = vpop.f32.mrf.mxu2 }
 0x487   : > { %v1988_v63 = vadd.f32 %v1987_v61, %v1922_v50 }
 0x488   : > { %v1952_v48 = vpop.f32.mrf.mxu1 }
 0x489   : > { %v2033_v12 = vadd.f32 %v1988_v63, %v1887_v59 }
 0x48b   : > { %2049 = vst [vmem:[%s2777_s25 + $0x8] sm:$0xff] %v2033_v12  ;;  %v1901_v12 = vld [vmem:[%s2777_s25 + $0x78] sm:$0xff] }
 0x48e   : > { %v1990_v17 = vpop.f32.mrf.mxu2 }
 0x48f   : > { %v1991_v56 = vadd.f32 %v1990_v17, %v1925_v49  ;;  %v1899_v49 = vld [vmem:[%s2777_s25 + $0x68] sm:$0xff] }
 0x490   : > { %v1955_v40 = vpop.f32.mrf.mxu1 }
 0x491   : > { %v2034_v28 = vadd.f32 %v1991_v56, %v1888_v62 }
 0x493   : > { %2050 = vst [vmem:[%s2777_s25 + $0x10] sm:$0xff] %v2034_v28 }
 0x496   : > { %v1993_v22 = vpop.f32.mrf.mxu2 }
 0x497   : > { %v1994_v18 = vadd.f32 %v1993_v22, %v1928_v51 }
 0x498   : > { %v1958_v53 = vpop.f32.mrf.mxu1 }
 0x499   : > { %v2035_v15 = vadd.f32 %v1994_v18, %v1889_v21 }
 0x49b   : > { %2051 = vst [vmem:[%s2777_s25 + $0x18] sm:$0xff] %v2035_v15 }
 0x49e   : > { %v1996_v24 = vpop.f32.mrf.mxu2 }
 0x49f   : > { %v1997_v10 = vadd.f32 %v1996_v24, %v1931_v34 }
 0x4a0   : > { %v1961_v57 = vpop.f32.mrf.mxu1 }
 0x4a1   : > { %v2036_v47 = vadd.f32 %v1997_v10, %v1890_v11 }
 0x4a3   : > { %2052 = vst [vmem:[%s2777_s25 + $0x20] sm:$0xff] %v2036_v47 }
 0x4a6   : > { %v1999_v9 = vpop.f32.mrf.mxu2 }
 0x4a7   : > { %v2000_v7 = vadd.f32 %v1999_v9, %v1934_v20 }
 0x4a8   : > { %v1964_v63 = vpop.f32.mrf.mxu1 }
 0x4a9   : > { %v2037_v35 = vadd.f32 %v2000_v7, %v1891_v8 }
 0x4ab   : > { %2053 = vst [vmem:[%s2777_s25 + $0x28] sm:$0xff] %v2037_v35 }
 0x4ae   : > { %v2002_v6 = vpop.f32.mrf.mxu2 }
 0x4af   : > { %v2003_v52 = vadd.f32 %v2002_v6, %v1937_v14 }
 0x4b1   : > { %v2038_v26 = vadd.f32 %v2003_v52, %v1892_v4 }
 0x4b3   : > { %2054 = vst [vmem:[%s2777_s25 + $0x30] sm:$0xff] %v2038_v26 }
 0x4b6   : > { %v2005_v27 = vpop.f32.mrf.mxu2 }
 0x4b7   : > { %v2006_v38 = vadd.f32 %v2005_v27, %v1940_v13 }
 0x4b9   : > { %v2039_v29 = vadd.f32 %v2006_v38, %v1893_v39 }
 0x4bb   : > { %2055 = vst [vmem:[%s2777_s25 + $0x38] sm:$0xff] %v2039_v29 }
 0x4be   : > { %v2008_v32 = vpop.f32.mrf.mxu2 }
 0x4bf   : > { %v2009_v46 = vadd.f32 %v2008_v32, %v1943_v25 }
 0x4c1   : > { %v2040_v0 = vadd.f32 %v2009_v46, %v1894_v30 }
 0x4c3   : > { %2056 = vst [vmem:[%s2777_s25 + $0x40] sm:$0xff] %v2040_v0 }
 0x4c6   : > { %v2011_v36 = vpop.f32.mrf.mxu2 }
 0x4c7   : > { %v2012_v5 = vadd.f32 %v2011_v36, %v1946_v1 }
 0x4c9   : > { %v2041_v37 = vadd.f32 %v2012_v5, %v1895_v3 }
 0x4cb   : > { %2057 = vst [vmem:[%s2777_s25 + $0x48] sm:$0xff] %v2041_v37 }
 0x4ce   : > { %v2014_v16 = vpop.f32.mrf.mxu2 }
 0x4cf   : > { %v2015_v2 = vadd.f32 %v2014_v16, %v1949_v33 }
 0x4d1   : > { %v2042_v31 = vadd.f32 %v2015_v2, %v1896_v43 }
 0x4d3   : > { %2058 = vst [vmem:[%s2777_s25 + $0x50] sm:$0xff] %v2042_v31 }
 0x4d6   : > { %v2017_v23 = vpop.f32.mrf.mxu2 }
 0x4d7   : > { %v2018_v19 = vadd.f32 %v2017_v23, %v1952_v48 }
 0x4d9   : > { %v2043_v42 = vadd.f32 %v2018_v19, %v1897_v54 }
 0x4db   : > { %2059 = vst [vmem:[%s2777_s25 + $0x58] sm:$0xff] %v2043_v42 }
 0x4de   : > { %v2020_v44 = vpop.f32.mrf.mxu2 }
 0x4df   : > { %v2021_v45 = vadd.f32 %v2020_v44, %v1955_v40 }
 0x4e1   : > { %v2044_v50 = vadd.f32 %v2021_v45, %v1898_v60 }
 0x4e3   : > { %2060 = vst [vmem:[%s2777_s25 + $0x60] sm:$0xff] %v2044_v50 }
 0x4e6   : > { %v2023_v51 = vpop.f32.mrf.mxu2 }
 0x4e7   : > { %v2024_v55 = vadd.f32 %v2023_v51, %v1958_v53 }
 0x4e9   : > { %v2045_v41 = vadd.f32 %v2024_v55, %v1899_v49 }
 0x4eb   : > { %2061 = vst [vmem:[%s2777_s25 + $0x68] sm:$0xff] %v2045_v41 }
 0x4ee   : > { %v2026_v59 = vpop.f32.mrf.mxu2 }
 0x4ef   : > { %v2027_v61 = vadd.f32 %v2026_v59, %v1961_v57 }
 0x4f1   : > { %v2046_v34 = vadd.f32 %v2027_v61, %v1900_v58 }
 0x4f3   : > { %2062 = vst [vmem:[%s2777_s25 + $0x70] sm:$0xff] %v2046_v34 }
 0x4f6   : > { %v2029_v62 = vpop.f32.mrf.mxu2 }
 0x4f7   : > { %v2030_v17 = vadd.f32 %v2029_v62, %v1964_v63 }
 0x4f9   : > { %v2047_v56 = vadd.f32 %v2030_v17, %v1901_v12 }
 0x4fb   : > { %2063 = vst [vmem:[%s2777_s25 + $0x78] sm:$0xff] %v2047_v56 }
 0x4fc   : > { %2539 = shalt.err (!%p2536_p7)
}
 0x4fd   : > { %s2595_s25 = smov 128   ;;  %s2596_s28 = smov 8  }
 0x4fe   : > { %2446 = dma.vmem_to_hbm [thread:$0]  (%p2697_p4), %s2078_s13, 2048, %s2080_s26, %s2065_s14, %s2595_s25, %s2595_s25, %s2596_s28  }
 0x4ff PF: > { %p2452_p9 = scmp.ge.s32.totalorder %s2590_s22, 2  ;;  %s2094_s30 = sand.u32 1, %s2570_s17  }
 0x500   : > { %s2095_s23 = scalar_lea.sflag [#allocation3], %s2094_s30 }
 0x501   : > { %p2449_p10 = pnand %p2452_p9, %p2704_p8 }
 0x503   : > { %p2450_p11 = pneg %p2449_p10 }
 0x505   : > { %2565 = dma.done.wait (%p2450_p11), %s2095_s23, 2048  }
 0x506   : > { %2567 = vsyncadd (%p2450_p11), %s2095_s23, 4294965248  ;;  %s24_s22 = sadd.s32 1, %s2590_s22   ;;  %s3648_s20 = sld [smem:[#allocation7_spill]] }
 0x507   : > { %p21_p12 = scmp.ge.s32.totalorder %s24_s22, 4   ;;  %s3649_s27 = sld [smem:[#allocation5_spill]] }
 0x508   : > { %s3650_s21 = sld [smem:[#allocation6_spill]]  ;;  %s3651_s17 = smov %s2574_s18 }
 0x509   : > { %s3652_s18 = smov %s2578_s19  ;;  %23 = sbr.rel (!%p21_p12) target bundleno = 4 (0x4), region = 113 }
 0x50c   : > { %s3653_s19 = smov %s3648_s20 }
 0x50d   : > { %s3654_s20 = smov %s3649_s27 }
 0x50e   :  { %2101 = vsyncpa [#allocation3], 1 }
 0x50f   :  { %2103 = vsyncpa [#allocation3 + $0x1], 1 }

</bundles_post_ra>
